<compile_context>
chip_gen: v5e
topology: v5e:2x2
jax: 0.10.0
libtpu: 0.0.40
codegen_flags: <defaults>
</compile_context>

<pallas_src>
import functools
import math

import jax
import jax.numpy as jnp
from jax import lax
from jax.experimental import pallas as pl
from jax.experimental.pallas import tpu as pltpu


def _round_up(a, b):
    return (a + b - 1) // b * b


# --------------------------------------------------------------------------------------
# Kernel A helpers: mean aggregation of neighbour rows via chunked one-hot @ x on the MXU
# --------------------------------------------------------------------------------------
def _mean_aggregate(nbr_ref, x_ref, tm, src_chunk):
    sp, cp = x_ref.shape
    nbr = nbr_ref[...]                                           # (TM, DEG_MAX) int32, -1 = pad

    # Degree from the neighbour table (O(TM*DEG_MAX)); keeps the XLU off the (TM, Sp) block.
    deg = jnp.sum((nbr >= 0).astype(jnp.float32), axis=1, keepdims=True)

    base = lax.broadcasted_iota(jnp.int32, (tm, src_chunk), 1)   # built once, reused per chunk
    acc = jnp.zeros((tm, cp), jnp.float32)
    for c0 in range(0, sp, src_chunk):                           # static chunking of src dim
        nbr_rel = nbr - c0                                       # shift ids into chunk-local range
        a = jnp.zeros((tm, src_chunk), jnp.float32)              # one-hot block stays in vregs
        for k in range(nbr.shape[1]):                            # static, small (max degree)
            a = a + (nbr_rel[:, k:k + 1] == base).astype(jnp.float32)
        # bf16 MXU feed (one-hot counts are exact in bf16), f32 accumulation.
        acc = acc + jnp.dot(a.astype(jnp.bfloat16), x_ref[c0:c0 + src_chunk, :],
                            preferred_element_type=jnp.float32)

    return acc * pl.reciprocal(jnp.maximum(deg, 1.0), approx=True)


def _sage_aggregate_kernel(nbr_ref, x_ref, his_ref, *, src_chunk):
    mean = _mean_aggregate(nbr_ref, x_ref, his_ref.shape[0], src_chunk)
    his_ref[...] = mean.astype(his_ref.dtype)


def _sage_aggregate_hist_kernel(tile_hit_ref, nbr_ref, x_ref, hflag_ref, hrow_ref,
                                his_ref, *, src_chunk):
    t = pl.program_id(0)
    mean = _mean_aggregate(nbr_ref, x_ref, his_ref.shape[0], src_chunk)

    @pl.when(tile_hit_ref[t] > 0)                                # tile has >=1 cached row
    def _():
        use_hist = hflag_ref[...] > 0
        his_ref[...] = jnp.where(use_hist, hrow_ref[...], mean).astype(his_ref.dtype)

    @pl.when(tile_hit_ref[t] == 0)                               # cold tile: skip the select
    def _():
        his_ref[...] = mean.astype(his_ref.dtype)


# --------------------------------------------------------------------------------------
# Kernel B: fused  out = his @ Wl + b + x_root @ Wr   (accumulates directly in out_ref)
# --------------------------------------------------------------------------------------
def _fused_linear_kernel(his_ref, xr_ref, wl_ref, wr_ref, b_ref, out_ref):
    k = pl.program_id(2)

    @pl.when(k == 0)
    def _():
        out_ref[...] = jnp.broadcast_to(b_ref[...], out_ref.shape)   # bias-initialized output

    out_ref[...] += (
        jnp.dot(his_ref[...].astype(jnp.bfloat16), wl_ref[...],
                preferred_element_type=jnp.float32)
        + jnp.dot(xr_ref[...], wr_ref[...], preferred_element_type=jnp.float32))


# --------------------------------------------------------------------------------------
# MySageConvHistory.forward
# --------------------------------------------------------------------------------------
def sage_conv_history_forward(x, ptr, idx, history_map, history_buffer, history_size,
                              num_node, w_l, b_l, w_r, *, max_degree=None,
                              tile_m_agg=64, src_chunk=256):
    """Pallas implementation of MySageConvHistory.forward. Returns (out, his)."""
    num_node = int(num_node)
    S, C = x.shape
    H = w_l.shape[0]

    Cp = _round_up(C, 128)
    Hp = _round_up(H, 128)
    # Kernel B row tile: 256 feeds the v6e/v7x 2x256^2 MXU natively; 128 otherwise / on v5e.
    tile_mb = 256 if num_node >= 256 else 128
    Np = _round_up(max(num_node, 1), tile_mb)
    tile_ma = min(tile_m_agg, Np)
    n_tiles = Np // tile_ma
    Sp = _round_up(max(S, Np), src_chunk)

    # ---- CSR -> padded neighbour table (O(E) gather; no dense [N,S] matrix, no scatter) ----
    ptr = ptr.astype(jnp.int32)
    idx = idx.astype(jnp.int32)
    deg = ptr[1:num_node + 1] - ptr[:num_node]
    if max_degree is None:
        # TODO(synk): pass a static max_degree to avoid this device->host sync / per-graph retrace.
        deg_max = int(pl.next_power_of_2(max(int(jnp.max(deg)), 1)))
    else:
        deg_max = int(max_degree)   # caller guarantees all degrees <= max_degree
    k_iota = jnp.arange(deg_max, dtype=jnp.int32)[None, :]
    pos = ptr[:num_node, None] + k_iota
    valid = k_iota < deg[:, None]
    nbr = jnp.where(valid, idx[jnp.clip(pos, 0, idx.shape[0] - 1)], -1)
    nbr_pad = jnp.full((Np, deg_max), -1, jnp.int32).at[:num_node].set(nbr)

    # bf16 features: the only reduced-precision MXU format shared by v5e/v6e/v7x.
    x_pad = jnp.zeros((Sp, Cp), jnp.bfloat16).at[:S, :C].set(x.astype(jnp.bfloat16))

    x_bytes = Sp * Cp * 2
    vmem_limit = int(min(max(2 * x_bytes + (16 << 20), 32 << 20), 60 << 20))
    agg_params = pltpu.CompilerParams(dimension_semantics=("parallel",),
                                      vmem_limit_bytes=vmem_limit)

    # ---- Kernel A: aggregation (+ fused history overwrite) ----
    if history_size > 0:
        # Resolve the history_buffer[history_map[d]] indirection in the wrapper (f32-exact rows).
        hmap = history_map.astype(jnp.int32)[:num_node]
        hflag = (hmap >= 0).astype(jnp.int32)
        safe = jnp.clip(hmap, 0, history_buffer.shape[0] - 1)
        hrow = jnp.where(hflag[:, None] > 0,
                         history_buffer[safe].astype(jnp.float32), 0.0)
        hflag_pad = jnp.zeros((Np, 1), jnp.int32).at[:num_node, 0].set(hflag)
        hrow_pad = jnp.zeros((Np, Cp), jnp.float32).at[:num_node, :C].set(hrow)
        # Per-tile hit flag (scalar prefetch): cold tiles skip the select and reuse hrow block 0.
        tile_hit = jnp.max(hflag_pad[:, 0].reshape(n_tiles, tile_ma), axis=1).astype(jnp.int32)

        his_pad = pl.pallas_call(
            functools.partial(_sage_aggregate_hist_kernel, src_chunk=src_chunk),
            out_shape=jax.ShapeDtypeStruct((Np, Cp), jnp.float32),
            grid_spec=pltpu.PrefetchScalarGridSpec(
                num_scalar_prefetch=1,
                grid=(n_tiles,),
                in_specs=[
                    pl.BlockSpec((tile_ma, deg_max), lambda t, th: (t, 0)),     # neighbour ids
                    pl.BlockSpec(memory_space=pltpu.MemorySpace.VMEM),          # x resident, 1 copy
                    pl.BlockSpec((tile_ma, 1), lambda t, th: (t, 0)),           # per-row hit flag
                    pl.BlockSpec((tile_ma, Cp), lambda t, th: (t * th[t], 0)),  # cached rows (remap)
                ],
                out_specs=pl.BlockSpec((tile_ma, Cp), lambda t, th: (t, 0)),
            ),
            compiler_params=agg_params,
        )(tile_hit, nbr_pad, x_pad, hflag_pad, hrow_pad)
    else:
        his_pad = pl.pallas_call(
            functools.partial(_sage_aggregate_kernel, src_chunk=src_chunk),
            out_shape=jax.ShapeDtypeStruct((Np, Cp), jnp.float32),
            grid=(n_tiles,),
            in_specs=[
                pl.BlockSpec((tile_ma, deg_max), lambda t: (t, 0)),
                pl.BlockSpec(memory_space=pltpu.MemorySpace.VMEM),
            ],
            out_specs=pl.BlockSpec((tile_ma, Cp), lambda t: (t, 0)),
            compiler_params=agg_params,
        )(nbr_pad, x_pad)

    # ---- Kernel B: fused lin_l + bias + lin_r (root weight; num_node > 0 assumed) ----
    wl_p = jnp.zeros((Cp, Hp), jnp.bfloat16).at[:C, :H].set(w_l.T.astype(jnp.bfloat16))
    wr_p = jnp.zeros((Cp, Hp), jnp.bfloat16).at[:C, :H].set(w_r.T.astype(jnp.bfloat16))
    bl_p = jnp.zeros((1, Hp), jnp.float32).at[0, :H].set(b_l.astype(jnp.float32))

    tn, tk = 128, 128
    out_pad = pl.pallas_call(
        _fused_linear_kernel,
        out_shape=jax.ShapeDtypeStruct((Np, Hp), jnp.float32),
        grid=(Np // tile_mb, Hp // tn, Cp // tk),
        in_specs=[
            pl.BlockSpec((tile_mb, tk), lambda i, j, k: (i, k)),   # his (f32, cast in-kernel)
            pl.BlockSpec((tile_mb, tk), lambda i, j, k: (i, k)),   # x_pad directly (no slice copy)
            pl.BlockSpec((tk, tn), lambda i, j, k: (k, j)),        # W_l^T (bf16)
            pl.BlockSpec((tk, tn), lambda i, j, k: (k, j)),        # W_r^T (bf16)
            pl.BlockSpec((1, tn), lambda i, j, k: (0, j)),         # bias (f32)
        ],
        out_specs=pl.BlockSpec((tile_mb, tn), lambda i, j, k: (i, j)),
        compiler_params=pltpu.CompilerParams(
            dimension_semantics=("parallel", "parallel", "arbitrary")),
    )(his_pad, x_pad, wl_p, wr_p, bl_p)

    out = out_pad[:num_node, :H]
    his = his_pad[:num_node, :C]
    # TODO(synk): need_grad / his.retain_grad() is torch-autograd bookkeeping; no Pallas analog.
    return out, his


# --------------------------------------------------------------------------------------
# HistorySAGE.forward (conv layers via Pallas; BN/ReLU/log_softmax are cheap XLA glue)
# --------------------------------------------------------------------------------------
def history_sage_forward(params, x, ptr, idx, num_node_in_layer, sub2embed,
                         cached_embedding, hidden_channels, training=True,
                         conv_fn=sage_conv_history_forward, max_degree=None):
    num_layers = len(params["convs"])
    produced = None
    h = x
    for i in range(num_layers - 1):
        c = params["convs"][i]
        n_i = num_node_in_layer[num_layers - 1 - i]
        if training and i == num_layers - 2:
            h, his = conv_fn(h, ptr, idx, sub2embed, cached_embedding,
                             hidden_channels, n_i, c["w_l"], c["b_l"], c["w_r"],
                             max_degree=max_degree)
            produced = his                      # table.produced_embedding = his
        else:
            h, his = conv_fn(h, ptr, idx, None, None, 0, n_i,
                             c["w_l"], c["b_l"], c["w_r"], max_degree=max_degree)
        bn = params["bns"][i]                   # training-mode BatchNorm1d (batch stats)
        mean = jnp.mean(h, axis=0)
        var = jnp.var(h, axis=0)
        h = (h - mean) / jnp.sqrt(var + 1e-5) * bn["gamma"] + bn["beta"]
        h = jax.nn.relu(h)
        # TODO(synk): dropout omitted (demo uses p=0; training dropout is stochastic).
    c = params["convs"][-1]
    h, _ = conv_fn(h, ptr, idx, None, None, 0, num_node_in_layer[0],
                   c["w_l"], c["b_l"], c["w_r"], max_degree=max_degree)
    return jax.nn.log_softmax(h, axis=-1), produced


def init_history_sage_params(key, in_channels, hidden_channels, out_channels, num_layers):
    chans = ([(in_channels, hidden_channels)]
             + [(hidden_channels, hidden_channels)] * (num_layers - 2)
             + [(hidden_channels, out_channels)])
    convs = []
    for (ci, co) in chans:
        key, k1, k2, k3 = jax.random.split(key, 4)
        bound = 1.0 / math.sqrt(ci)
        convs.append(dict(
            w_l=jax.random.uniform(k1, (co, ci), minval=-bound, maxval=bound, dtype=jnp.float32),
            b_l=jax.random.uniform(k2, (co,), minval=-bound, maxval=bound, dtype=jnp.float32),
            w_r=jax.random.uniform(k3, (co, ci), minval=-bound, maxval=bound, dtype=jnp.float32)))
    bns = []
    for _ in range(num_layers - 1):
        key, k1, k2 = jax.random.split(key, 3)
        bns.append(dict(gamma=1.0 + 0.1 * jax.random.normal(k1, (hidden_channels,), jnp.float32),
                        beta=0.1 * jax.random.normal(k2, (hidden_channels,), jnp.float32)))
    return dict(convs=convs, bns=bns)


# --------------------------------------------------------------------------------------
# Pure-JAX reference (identical semantics, f32 throughout)
# --------------------------------------------------------------------------------------
def _ref_sage_conv(x, ptr, idx, history_map, history_buffer, history_size,
                   num_node, w_l, b_l, w_r, *, max_degree=None):
    del max_degree
    num_node = int(num_node)
    C = x.shape[1]
    deg = (ptr[1:num_node + 1] - ptr[:num_node]).astype(jnp.int32)
    num_edge = int(ptr[num_node])
    dst = jnp.repeat(jnp.arange(num_node, dtype=jnp.int32), deg,
                     total_repeat_length=num_edge)
    src = idx[:num_edge].astype(jnp.int32)
    agg = jnp.zeros((num_node, C), jnp.float32).at[dst].add(x[src].astype(jnp.float32))
    agg = agg / jnp.maximum(deg, 1).astype(jnp.float32)[:, None]
    if history_size > 0:
        hmap = history_map[:num_node].astype(jnp.int32)
        safe = jnp.clip(hmap, 0, history_buffer.shape[0] - 1)
        agg = jnp.where((hmap >= 0)[:, None],
                        history_buffer[safe].astype(jnp.float32), agg)
    out = agg @ w_l.T + b_l + x[:num_node].astype(jnp.float32) @ w_r.T
    return out, agg


if __name__ == "__main__":
    key = jax.random.PRNGKey(0)
    in_channels, hidden_channels, out_channels = 96, 128, 32
    num_layers = 2
    N0, N1, N2 = 40, 80, 200          # num_node_in_layer (dst nodes per layer; x has N2 rows)
    cache_rows = 16
    MAX_DEG = 8                        # static degree cap (demo degrees are 1..6)

    keys = jax.random.split(key, 10)
    x = jax.random.normal(keys[0], (N2, in_channels), dtype=jnp.float32)

    # CSR graph with variable degrees 1..6 for the N1 destination nodes.
    deg = jax.random.randint(keys[1], (N1,), 1, 7, dtype=jnp.int32)
    ptr = jnp.concatenate([jnp.zeros((1,), jnp.int32), jnp.cumsum(deg)]).astype(jnp.int32)
    e0 = int(ptr[N0])
    e_total = int(ptr[N1])
    idx = jnp.concatenate([
        jax.random.randint(keys[2], (e0,), 0, N1, dtype=jnp.int32),        # layer-1-valid edges
        jax.random.randint(keys[3], (e_total - e0,), 0, N2, dtype=jnp.int32),
    ])

    # History cache for the layer-0 conv (training path): ~30% of dst nodes cached.
    sub2embed = jnp.where(jax.random.uniform(keys[4], (N1,)) < 0.3,
                          jax.random.randint(keys[5], (N1,), 0, cache_rows, dtype=jnp.int32),
                          -1).astype(jnp.int32)
    cached_embedding = jax.random.normal(keys[6], (cache_rows, in_channels), dtype=jnp.float32)

    params = init_history_sage_params(keys[7], in_channels, hidden_channels,
                                      out_channels, num_layers)
    num_node_in_layer = [N0, N1, N2]

    # ---- single MySageConvHistory layer (with history) vs reference ----
    c0 = params["convs"][0]
    out_p, his_p = sage_conv_history_forward(x, ptr, idx, sub2embed, cached_embedding,
                                             hidden_channels, N1,
                                             c0["w_l"], c0["b_l"], c0["w_r"],
                                             max_degree=MAX_DEG)
    out_p = jax.block_until_ready(out_p)
    out_r, his_r = _ref_sage_conv(x, ptr, idx, sub2embed, cached_embedding,
                                  hidden_channels, N1, c0["w_l"], c0["b_l"], c0["w_r"])
    assert out_p.shape == (N1, hidden_channels) and his_p.shape == (N1, in_channels)
    # bf16 MXU feeds + approx reciprocal => compare against the f32 reference at bf16 tolerance.
    assert jnp.allclose(his_p, his_r, atol=1e-2, rtol=1e-2), "his mismatch vs reference"
    assert jnp.allclose(out_p, out_r, atol=2e-2, rtol=2e-2), "conv out mismatch vs reference"

    # ---- full HistorySAGE forward (training path: layer-0 conv consumes the history cache) ----
    logp_p, produced_p = history_sage_forward(params, x, ptr, idx, num_node_in_layer,
                                              sub2embed, cached_embedding, hidden_channels,
                                              training=True,
                                              conv_fn=sage_conv_history_forward,
                                              max_degree=MAX_DEG)
    logp_p = jax.block_until_ready(logp_p)
    logp_r, produced_r = history_sage_forward(params, x, ptr, idx, num_node_in_layer,
                                              sub2embed, cached_embedding, hidden_channels,
                                              training=True, conv_fn=_ref_sage_conv,
                                              max_degree=MAX_DEG)
    assert logp_p.shape == (N0, out_channels)
    assert jnp.allclose(logp_p, logp_r, atol=5e-2, rtol=5e-2), "model output mismatch"
    assert jnp.allclose(produced_p, produced_r, atol=1e-2, rtol=1e-2), "produced his mismatch"

    print("KERNEL_OK")
</pallas_src>

<mosaic_0001>
module attributes {stable_mosaic.version = 11 : i64} {
  func.func @_sage_aggregate_hist_kernel(%arg0: i32, %arg1: memref<2xi32, #tpu.memory_space<smem>>, %arg2: memref<64x8xi32, #tpu.memory_space<vmem>>, %arg3: memref<256x128xbf16, #tpu.memory_space<vmem>>, %arg4: memref<64x1xi32, #tpu.memory_space<vmem>>, %arg5: memref<64x128xf32, #tpu.memory_space<vmem>>, %arg6: memref<64x128xf32, #tpu.memory_space<vmem>>) attributes {dimension_semantics = [#tpu.dimension_semantics<parallel>], iteration_bounds = array<i64: 2>, scalar_prefetch = 1 : i64, scratch_operands = 0 : i64, tpu.core_type = #tpu.core_type<tc>, window_params = [{transform_indices = @transform_0, window_bounds = array<i64: 64, 8>}, {pipeline_mode = #tpu.pipeline_mode<synchronous>, transform_indices = @transform_1, window_bounds = array<i64: 256, 128>}, {transform_indices = @transform_2, window_bounds = array<i64: 64, 1>}, {transform_indices = @transform_3, window_bounds = array<i64: 64, 128>}, {transform_indices = @transform_4, window_bounds = array<i64: 64, 128>}]} {
    %c0 = arith.constant 0 : index
    %c0_0 = arith.constant 0 : index
    %0 = vector.load %arg2[%c0, %c0_0] : memref<64x8xi32, #tpu.memory_space<vmem>>, vector<64x8xi32>
    %c0_i32 = arith.constant 0 : i32
    %1 = vector.broadcast %c0_i32 : i32 to vector<64x8xi32>
    %2 = arith.cmpi sge, %0, %1 : vector<64x8xi32>
    %3 = arith.extui %2 : vector<64x8xi1> to vector<64x8xi32>
    %4 = arith.sitofp %3 : vector<64x8xi32> to vector<64x8xf32>
    %cst = arith.constant dense<0.000000e+00> : vector<64xf32>
    %5 = vector.multi_reduction <add>, %4, %cst [1] : vector<64x8xf32> to vector<64xf32>
    %6 = vector.shape_cast %5 : vector<64xf32> to vector<64x1xf32>
    %7 = tpu.iota {dimensions = array<i32: 1>} : vector<64x256xi32>
    %cst_1 = arith.constant 0.000000e+00 : f32
    %8 = vector.broadcast %cst_1 : f32 to vector<64x128xf32>
    %c0_i32_2 = arith.constant 0 : i32
    %9 = vector.broadcast %c0_i32_2 : i32 to vector<64x8xi32>
    %10 = arith.subi %0, %9 : vector<64x8xi32>
    %cst_3 = arith.constant 0.000000e+00 : f32
    %11 = vector.broadcast %cst_3 : f32 to vector<64x256xf32>
    %12 = vector.extract_strided_slice %10 {offsets = [0, 0], sizes = [64, 1], strides = [1, 1]} : vector<64x8xi32> to vector<64x1xi32>
    %13 = vector.broadcast %12 : vector<64x1xi32> to vector<64x256xi32>
    %14 = arith.cmpi eq, %13, %7 : vector<64x256xi32>
    %15 = arith.extui %14 : vector<64x256xi1> to vector<64x256xi32>
    %16 = arith.sitofp %15 : vector<64x256xi32> to vector<64x256xf32>
    %17 = arith.addf %11, %16 : vector<64x256xf32>
    %18 = vector.extract_strided_slice %10 {offsets = [0, 1], sizes = [64, 1], strides = [1, 1]} : vector<64x8xi32> to vector<64x1xi32>
    %19 = vector.broadcast %18 : vector<64x1xi32> to vector<64x256xi32>
    %20 = arith.cmpi eq, %19, %7 : vector<64x256xi32>
    %21 = arith.extui %20 : vector<64x256xi1> to vector<64x256xi32>
    %22 = arith.sitofp %21 : vector<64x256xi32> to vector<64x256xf32>
    %23 = arith.addf %17, %22 : vector<64x256xf32>
    %24 = vector.extract_strided_slice %10 {offsets = [0, 2], sizes = [64, 1], strides = [1, 1]} : vector<64x8xi32> to vector<64x1xi32>
    %25 = vector.broadcast %24 : vector<64x1xi32> to vector<64x256xi32>
    %26 = arith.cmpi eq, %25, %7 : vector<64x256xi32>
    %27 = arith.extui %26 : vector<64x256xi1> to vector<64x256xi32>
    %28 = arith.sitofp %27 : vector<64x256xi32> to vector<64x256xf32>
    %29 = arith.addf %23, %28 : vector<64x256xf32>
    %30 = vector.extract_strided_slice %10 {offsets = [0, 3], sizes = [64, 1], strides = [1, 1]} : vector<64x8xi32> to vector<64x1xi32>
    %31 = vector.broadcast %30 : vector<64x1xi32> to vector<64x256xi32>
    %32 = arith.cmpi eq, %31, %7 : vector<64x256xi32>
    %33 = arith.extui %32 : vector<64x256xi1> to vector<64x256xi32>
    %34 = arith.sitofp %33 : vector<64x256xi32> to vector<64x256xf32>
    %35 = arith.addf %29, %34 : vector<64x256xf32>
    %36 = vector.extract_strided_slice %10 {offsets = [0, 4], sizes = [64, 1], strides = [1, 1]} : vector<64x8xi32> to vector<64x1xi32>
    %37 = vector.broadcast %36 : vector<64x1xi32> to vector<64x256xi32>
    %38 = arith.cmpi eq, %37, %7 : vector<64x256xi32>
    %39 = arith.extui %38 : vector<64x256xi1> to vector<64x256xi32>
    %40 = arith.sitofp %39 : vector<64x256xi32> to vector<64x256xf32>
    %41 = arith.addf %35, %40 : vector<64x256xf32>
    %42 = vector.extract_strided_slice %10 {offsets = [0, 5], sizes = [64, 1], strides = [1, 1]} : vector<64x8xi32> to vector<64x1xi32>
    %43 = vector.broadcast %42 : vector<64x1xi32> to vector<64x256xi32>
    %44 = arith.cmpi eq, %43, %7 : vector<64x256xi32>
    %45 = arith.extui %44 : vector<64x256xi1> to vector<64x256xi32>
    %46 = arith.sitofp %45 : vector<64x256xi32> to vector<64x256xf32>
    %47 = arith.addf %41, %46 : vector<64x256xf32>
    %48 = vector.extract_strided_slice %10 {offsets = [0, 6], sizes = [64, 1], strides = [1, 1]} : vector<64x8xi32> to vector<64x1xi32>
    %49 = vector.broadcast %48 : vector<64x1xi32> to vector<64x256xi32>
    %50 = arith.cmpi eq, %49, %7 : vector<64x256xi32>
    %51 = arith.extui %50 : vector<64x256xi1> to vector<64x256xi32>
    %52 = arith.sitofp %51 : vector<64x256xi32> to vector<64x256xf32>
    %53 = arith.addf %47, %52 : vector<64x256xf32>
    %54 = vector.extract_strided_slice %10 {offsets = [0, 7], sizes = [64, 1], strides = [1, 1]} : vector<64x8xi32> to vector<64x1xi32>
    %55 = vector.broadcast %54 : vector<64x1xi32> to vector<64x256xi32>
    %56 = arith.cmpi eq, %55, %7 : vector<64x256xi32>
    %57 = arith.extui %56 : vector<64x256xi1> to vector<64x256xi32>
    %58 = arith.sitofp %57 : vector<64x256xi32> to vector<64x256xf32>
    %59 = arith.addf %53, %58 : vector<64x256xf32>
    %60 = arith.truncf %59 : vector<64x256xf32> to vector<64x256xbf16>
    %c0_4 = arith.constant 0 : index
    %c0_5 = arith.constant 0 : index
    %61 = vector.load %arg3[%c0_4, %c0_5] : memref<256x128xbf16, #tpu.memory_space<vmem>>, vector<256x128xbf16>
    %cst_6 = arith.constant dense<0.000000e+00> : vector<64x128xf32>
    %62 = tpu.matmul %60, %61, %cst_6 {dimension_numbers = #tpu.dot_dimension_numbers<[1], [0], [0], [1], [0, 0, 1, 1], [], []>} : vector<64x256xbf16>, vector<256x128xbf16>, vector<64x128xf32> -> vector<64x128xf32>
    %63 = arith.addf %8, %62 : vector<64x128xf32>
    %cst_7 = arith.constant 1.000000e+00 : f32
    %64 = vector.broadcast %cst_7 : f32 to vector<64x1xf32>
    %65 = arith.maximumf %6, %64 : vector<64x1xf32>
    %66 = tpu.reciprocal %65 {approx = true} : vector<64x1xf32> -> vector<64x1xf32>
    %67 = vector.broadcast %66 : vector<64x1xf32> to vector<64x128xf32>
    %68 = arith.mulf %63, %67 : vector<64x128xf32>
    %69 = arith.index_cast %arg0 : i32 to index
    %70 = memref.load %arg1[%69] : memref<2xi32, #tpu.memory_space<smem>>
    %c0_i32_8 = arith.constant 0 : i32
    %71 = arith.cmpi sgt, %70, %c0_i32_8 : i32
    %72 = arith.extui %71 : i1 to i32
    %c0_i32_9 = arith.constant 0 : i32
    %73 = arith.cmpi ne, %72, %c0_i32_9 : i32
    scf.if %73 {
      %c0_12 = arith.constant 0 : index
      %c0_13 = arith.constant 0 : index
      %79 = vector.load %arg4[%c0_12, %c0_13] : memref<64x1xi32, #tpu.memory_space<vmem>>, vector<64x1xi32>
      %c0_i32_14 = arith.constant 0 : i32
      %80 = vector.broadcast %c0_i32_14 : i32 to vector<64x1xi32>
      %81 = arith.cmpi sgt, %79, %80 : vector<64x1xi32>
      %c0_15 = arith.constant 0 : index
      %c0_16 = arith.constant 0 : index
      %82 = vector.load %arg5[%c0_15, %c0_16] : memref<64x128xf32, #tpu.memory_space<vmem>>, vector<64x128xf32>
      %83 = vector.shape_cast %81 : vector<64x1xi1> to vector<64x1xi1>
      %84 = vector.broadcast %83 : vector<64x1xi1> to vector<64x128xi1>
      %85 = arith.select %84, %82, %68 : vector<64x128xi1>, vector<64x128xf32>
      %c0_17 = arith.constant 0 : index
      %c0_18 = arith.constant 0 : index
      %86 = vector.load %arg6[%c0_17, %c0_18] : memref<64x128xf32, #tpu.memory_space<vmem>>, vector<64x128xf32>
      tpu.vector_store %arg6[%c0_17, %c0_18], %85 {strides = array<i32>} : memref<64x128xf32, #tpu.memory_space<vmem>>, vector<64x128xf32>,
    } else {
    }
    %74 = arith.index_cast %arg0 : i32 to index
    %75 = memref.load %arg1[%74] : memref<2xi32, #tpu.memory_space<smem>>
    %c0_i32_10 = arith.constant 0 : i32
    %76 = arith.cmpi eq, %75, %c0_i32_10 : i32
    %77 = arith.extui %76 : i1 to i32
    %c0_i32_11 = arith.constant 0 : i32
    %78 = arith.cmpi ne, %77, %c0_i32_11 : i32
    scf.if %78 {
      %c0_12 = arith.constant 0 : index
      %c0_13 = arith.constant 0 : index
      %79 = vector.load %arg6[%c0_12, %c0_13] : memref<64x128xf32, #tpu.memory_space<vmem>>, vector<64x128xf32>
      tpu.vector_store %arg6[%c0_12, %c0_13], %68 {strides = array<i32>} : memref<64x128xf32, #tpu.memory_space<vmem>>, vector<64x128xf32>,
    } else {
    }
    return
  }
  func.func @transform_0(%arg0: i32, %arg1: memref<2xi32, #tpu.memory_space<smem>>) -> (i32, i32) {
    %c0_i32 = arith.constant 0 : i32
    %c0_i32_0 = arith.constant 0 : i32
    return %arg0, %c0_i32 : i32, i32
  }
  func.func @transform_1(%arg0: i32, %arg1: memref<2xi32, #tpu.memory_space<smem>>) -> (i32, i32) {
    %c0_i32 = arith.constant 0 : i32
    %c0_i32_0 = arith.constant 0 : i32
    %c0_i32_1 = arith.constant 0 : i32
    return %c0_i32, %c0_i32_0 : i32, i32
  }
  func.func @transform_2(%arg0: i32, %arg1: memref<2xi32, #tpu.memory_space<smem>>) -> (i32, i32) {
    %c0_i32 = arith.constant 0 : i32
    %c0_i32_0 = arith.constant 0 : i32
    return %arg0, %c0_i32 : i32, i32
  }
  func.func @transform_3(%arg0: i32, %arg1: memref<2xi32, #tpu.memory_space<smem>>) -> (i32, i32) {
    %0 = arith.index_cast %arg0 : i32 to index
    %1 = memref.load %arg1[%0] : memref<2xi32, #tpu.memory_space<smem>>
    %2 = arith.muli %arg0, %1 : i32
    %c0_i32 = arith.constant 0 : i32
    %c0_i32_0 = arith.constant 0 : i32
    return %2, %c0_i32 : i32, i32
  }
  func.func @transform_4(%arg0: i32, %arg1: memref<2xi32, #tpu.memory_space<smem>>) -> (i32, i32) {
    %c0_i32 = arith.constant 0 : i32
    %c0_i32_0 = arith.constant 0 : i32
    return %arg0, %c0_i32 : i32, i32
  }
}

</mosaic_0001>

<bundles_post_ra>
// kernel: tpu_custom_call.1
= control target key start
LH: loop header
LB: loop body
LE: loop exit
PB: predicated region body
PF: predicated region fallthrough
CT: control target
= control target key end

     0   :  { %s1891_s21 = smov [#allocation3]   ;;  %s2745_s0 = inlined_call_operand.vmem [shape: s32[2], index: 0, kind: input, shape index: {}]   ;;  %s2746_s1 = inlined_call_operand.vmem [shape: s32[128,8], index: 1, kind: input, shape index: {}]   ;;  %s2747_s2 = inlined_call_operand.vmem [shape: bf16[256,128], index: 2, kind: input, shape index: {}]   ;;  %s2748_s3 = inlined_call_operand.vmem [shape: s32[128,1], index: 3, kind: input, shape index: {}]   ;;  %s2749_s4 = inlined_call_operand.vmem [shape: f32[128,128], index: 4, kind: input, shape index: {}]   ;;  %s2750_s5 = inlined_call_operand.hbm [shape: f32[128,128], index: 5, kind: output, shape index: {}]  }
   0x1   :  { %s11_s20 = sshll.u32 %s2745_s0, 4  ;;  %s12_s20 = int_to_ptr.vmem [resolvable:$true] %s11_s20 }
   0x2   :  { %14 = dma.vmem_to_smem %s12_s20, 16, %s1891_s21, [#allocation2] }
   0x3   :  { %1869 = dma.done.wait [#allocation2], 16 }
   0x4   :  { %1870 = vsyncadd [#allocation2], 4294967280 }
   0x5   :  { %17 = sfence }
   0x6   :  { %18 = vsyncpa [#allocation5], 0 }
   0x7   :  { %20 = vsyncpa [#allocation5 + $0x1], 0  ;;  %s1937_s22 = smov 0   ;;  %s1939_s23 = smov 0  }
   0x8   :  { %s1941_s24 = smov 0   ;;  %s1943_s25 = smov 0  }
   0x9 LB: > { %s1958_s0 = sadd.s32 4294967295, %s1889_s25   ;;  %s1448_s26 = sadd.s32 4294967294, %s1889_s25   ;;  %s1889_s25 = sphi %s1943_s25, %s2756_s25   ;;  %s1885_s24 = sphi %s1941_s24, %s2755_s24   ;;  %s1881_s23 = sphi %s1939_s23, %s2754_s23   ;;  %s1877_s22 = sphi %s1937_s22, %s2753_s22  }
   0xa   : > { %s1962_s27 = sadd.s32 1, %s1889_s25   ;;  %s136_s28 = sadd.s32 1, %s1885_s24 }
   0xb   : > { %s133_s29 = ssub.s32 %s1889_s25, %s1962_s27  ;;  %p146_p0 = scmp.ne.s32.totalorder %s1885_s24, %s1881_s23 }
   0xc   : > { %p134_p1 = scmp.eq.s32.totalorder %s133_s29, 0  ;;  %p147_p2 = scmp.eq.s32.totalorder %s1958_s0, 1 }
   0xd   : > { %p152_p3 = scmp.ne.s32.totalorder %s1881_s23, %s1877_s22  ;;  %p153_p4 = scmp.eq.s32.totalorder %s1448_s26, 1 }
   0xe   : > { %s1973_s30 = scalar_select %p134_p1, %s1885_s24, %s136_s28  }
   0xf   : > { %p1975_p5 = por %p147_p2, %p146_p0  ;;  %p1979_p6 = por %p153_p4, %p152_p3 }
  0x10   : > { %p1451_p7 = scmp.ge.s32.totalorder %s1889_s25, 1  ;;  %p205_p8 = scmp.lt.s32.totalorder %s1889_s25, 3 }
  0x12   : > { %p206_p9 = pnand %p1451_p7, %p205_p8 }
  0x13   : > { %s1453_s8 = sshll.u32 (!%p206_p9), %s1958_s0, 3  ;;  %s240_s16 = sand.u32 (!%p206_p9), 1, %s1881_s23  }
  0x14   : > { %209 = sbr.rel (%p206_p9) target bundleno = 708 (0x2c4), region = 36  ;;  %p244_p10 = scmp.lt.s32.totalorder (!%p206_p9), %s1453_s8, 15 }
  0x15   : > { %s255_s17 = sld [smem:[#allocation3 + %s1958_s0]] (!%p206_p9)  ;;  %s2114_s18 = sshll.u32 (!%p206_p9), %s240_s16, 6 }
  0x16   : > { %s2632_s14 = sld [smem:[#allocation3 + %s1958_s0]] (!%p206_p9) }
  0x19   : > { %v1892_v0 = vmov 0   ;;  %s2758_s8 = smov (!%p244_p10, %s1453_s8), 15  ;;  %vm298_vm0 = vcmask 64512   ;;  %v1893_v7 = vmov 0.0   ;;  %v1894_v26 = vmov 1  }
  0x1a   : > { %1751 = vset.pattern.permute.xlu2 %v1892_v0  ;;  %1752 = vset.pattern.permute.xlu0 %v1892_v0  ;;  %s1454_s9 = sshll.u32 %s2758_s8, 3  ;;  %v1895_v27 = vmov 2   ;;  %v1896_v28 = vmov 5   ;;  %v1897_v29 = vmov 4   ;;  %v1898_v30 = vmov 3  }
  0x1b   : > { %1753 = vset.pattern.permute.xlu1 %v1892_v0  ;;  %s1989_s12 = scalar_lea.vmem %s2746_s1, %s1454_s9  ;;  %s1994_s15 = scalar_lea.vmem %s2748_s3, %s1454_s9  ;;  %v1899_v33 = vmov 6   ;;  %v1900_v40 = vmov 7   ;;  %v323_v43 = vlaneseq }
  0x1c   : > { %v1997_v1 = vld [vmem:[%s1989_s12 + $0x20] sm:$0xff]  ;;  %v2000_v2 = vld [vmem:[%s1989_s12 + $0x10] sm:$0xff]  ;;  %v2009_v4 = vld [vmem:[%s1989_s12 + $0x28] sm:$0xff]  ;;  %s256_s19 = smul.u32 %s1958_s0, %s255_s17  ;;  %s2659_s17 = scalar_lea.vmem [#allocation4], %s2114_s18 }
  0x1d   : > { %v2003_v3 = vld [vmem:[%s1989_s12] sm:$0xff]  ;;  %vm278_vm1 = vcmp.ge.s32.totalorder %v1997_v1, 0  ;;  %vm276_vm2 = vcmp.ge.s32.totalorder %v2000_v2, 0  ;;  %v2012_v5 = vld [vmem:[%s1989_s12 + $0x18] sm:$0xff]  ;;  %v2015_v6 = vld [vmem:[%s1989_s12 + $0x8] sm:$0xff]  ;;  %vm279_vm4 = vcmp.ge.s32.totalorder %v2009_v4, 0 }
  0x1e   : > { %vm274_vm3 = vcmp.ge.s32.totalorder %v2003_v3, 0  ;;  %v1463_v8 = vsel %vm278_vm1, 1.0, %v1893_v7  ;;  %v1461_v9 = vsel %vm276_vm2, 1.0, %v1893_v7  ;;  %vm277_vm5 = vcmp.ge.s32.totalorder %v2012_v5, 0  ;;  %v2030_v17 = vld [vmem:[%s1989_s12 + $0x38] sm:$0xff]  ;;  %v2035_v20 = vld [vmem:[%s1989_s12 + $0x30] sm:$0xff] }
  0x1f   : > { %v1459_v10 = vsel %vm274_vm3, 1.0, %v1893_v7  ;;  %v311_v11 = vsel %vm298_vm0, %v1463_v8, 0.0  ;;  %v305_v12 = vsel %vm298_vm0, %v1461_v9, 0.0  ;;  %vm275_vm6 = vcmp.ge.s32.totalorder %v2015_v6, 0  ;;  %s1457_s20 = sshll.u32 %s256_s19, 3  ;;  %p1659_p12 = scmp.le.s32.totalorder %s2632_s14, 0 }
  0x20   : > { %v299_v13 = vsel %vm298_vm0, %v1459_v10, 0.0  ;;  %312 = vadd.xlane.f32.xlu2 %v311_v11  ;;  %306 = vadd.xlane.f32.xlu1 %v305_v12  ;;  %v1464_v14 = vsel %vm279_vm4, 1.0, %v1893_v7  ;;  %v1462_v15 = vsel %vm277_vm5, 1.0, %v1893_v7  ;;  %v1460_v16 = vsel %vm275_vm6, 1.0, %v1893_v7  ;;  %p258_p11 = scmp.lt.s32.totalorder %s1457_s20, 15 }
  0x21   : > { %300 = vadd.xlane.f32.xlu0 %v299_v13  ;;  %v314_v18 = vsel %vm298_vm0, %v1464_v14, 0.0  ;;  %v308_v19 = vsel %vm298_vm0, %v1462_v15, 0.0  ;;  %v302_v21 = vsel %vm298_vm0, %v1460_v16, 0.0  ;;  %vm281_vm7 = vcmp.ge.s32.totalorder %v2030_v17, 0 }
  0x22   : > { %vm280_vm8 = vcmp.ge.s32.totalorder %v2035_v20, 0  ;;  %v1466_v22 = vsel %vm281_vm7, 1.0, %v1893_v7  ;;  %v2126_v45 = vand.u32 127, %v323_v43  ;;  %s2760_s20 = smov (!%p258_p11, %s1457_s20), 15 }
  0x23   : > { %v1465_v23 = vsel %vm280_vm8, 1.0, %v1893_v7  ;;  %v320_v24 = vsel %vm298_vm0, %v1466_v22, 0.0  ;;  %s1458_s21 = sshll.u32 %s2760_s20, 3 }
  0x24   : > { %v317_v25 = vsel %vm298_vm0, %v1465_v23, 0.0  ;;  %s2132_s29 = scalar_lea.vmem %s2749_s4, %s1458_s21  ;;  %v2135_v47 = vadd.s32 128, %v2126_v45 }
  0x28   : > { %315 = vadd.xlane.f32.xlu2 %v314_v18  ;;  %309 = vadd.xlane.f32.xlu1 %v308_v19 }
  0x29   : > { %303 = vadd.xlane.f32.xlu0 %v302_v21 }
  0x30   : > { %321 = vadd.xlane.f32.xlu1 %v320_v24 }
  0x31   : > { %318 = vadd.xlane.f32.xlu0 %v317_v25 }
  0x40   : > { %327 = vperm.xlu2 %1751, %v2003_v3  }
  0x45   : > { %330 = vperm.xlu0 %1752, %v2015_v6  }
  0x48   : > { %336 = vperm.xlu2 %1751, %v2012_v5  }
  0x49   : > { %333 = vperm.xlu1 %1753, %v2000_v2  }
  0x4d   : > { %1754 = vset.pattern.permute.xlu0 %v1894_v26 }
  0x4e   : > { %415 = vperm.xlu0 %1754, %v2003_v3  }
  0x50   : > { %339 = vperm.xlu2 %1751, %v1997_v1  }
  0x51   : > { %342 = vperm.xlu1 %1753, %v2009_v4  }
  0x56   : > { %430 = vperm.xlu0 %1754, %v2009_v4  }
  0x58   : > { %345 = vperm.xlu2 %1751, %v2035_v20  }
  0x59   : > { %348 = vperm.xlu1 %1753, %v2030_v17  }
  0x5e   : > { %1757 = vset.pattern.permute.xlu0 %v1895_v27 }
  0x5f   : > { %503 = vperm.xlu0 %1757, %v2003_v3  }
  0x60   : > { %1755 = vset.pattern.permute.xlu2 %v1894_v26 }
  0x61   : > { %1756 = vset.pattern.permute.xlu1 %v1894_v26  ;;  %418 = vperm.xlu2 %1755, %v2015_v6  }
  0x62   : > { %421 = vperm.xlu1 %1756, %v2000_v2  }
  0x67   : > { %518 = vperm.xlu0 %1757, %v2009_v4  }
  0x69   : > { %424 = vperm.xlu2 %1755, %v2012_v5  }
  0x6a   : > { %427 = vperm.xlu1 %1756, %v1997_v1  }
  0x6f   : > { %1764 = vset.pattern.permute.xlu0 %v1896_v28 }
  0x70   : > { %779 = vperm.xlu0 %1764, %v1997_v1  }
  0x71   : > { %433 = vperm.xlu2 %1755, %v2035_v20  }
  0x72   : > { %436 = vperm.xlu1 %1756, %v2030_v17  }
  0x78   : > { %1769 = vset.pattern.permute.xlu0 %v1897_v29 }
  0x79   : > { %682 = vperm.xlu0 %1769, %v2015_v6   ;;  %1758 = vset.pattern.permute.xlu2 %v1895_v27 }
  0x7a   : > { %1759 = vset.pattern.permute.xlu1 %v1895_v27  ;;  %506 = vperm.xlu2 %1758, %v2015_v6  }
  0x7b   : > { %509 = vperm.xlu1 %1759, %v2000_v2  }
  0x81   : > { %1770 = vset.pattern.permute.xlu0 %v1898_v30 }
  0x82   : > { %591 = vperm.xlu0 %1770, %v2003_v3   ;;  %512 = vperm.xlu2 %1758, %v2012_v5  }
  0x83   : > { %515 = vperm.xlu1 %1759, %v1997_v1  }
  0x8a   : > { %606 = vperm.xlu0 %1770, %v2009_v4   ;;  %521 = vperm.xlu2 %1758, %v2035_v20  }
  0x8b   : > { %524 = vperm.xlu1 %1759, %v2030_v17  }
  0x92   : > { %612 = vperm.xlu0 %1770, %v2030_v17   ;;  %1760 = vset.pattern.permute.xlu2 %v1898_v30 }
  0x93   : > { %v2077_v31 = vpop.xlane.xlu2 %312  ;;  %1761 = vset.pattern.permute.xlu1 %v1898_v30  ;;  %594 = vperm.xlu2 %1760, %v2015_v6   ;;  %v2090_v35 = vpop.xlane.xlu1 %306 }
  0x94   : > { %597 = vperm.xlu1 %1761, %v2000_v2   ;;  %v2082_v32 = vpop.xlane.xlu0 %300 }
  0x9a   : > { %1779 = vset.pattern.permute.xlu0 %v1899_v33 }
  0x9b   : > { %v2085_v34 = vpop.xlane.xlu2 %315  ;;  %600 = vperm.xlu2 %1760, %v2012_v5   ;;  %855 = vperm.xlu0 %1779, %v2003_v3   ;;  %v2099_v38 = vpop.xlane.xlu1 %309 }
  0x9c   : > { %603 = vperm.xlu1 %1761, %v1997_v1   ;;  %v2093_v37 = vpop.xlane.xlu0 %303 }
  0xa3   : > { %1762 = vset.pattern.permute.xlu2 %v1897_v29  ;;  %v328_v36 = vpop.permute.xlu2 %327  ;;  %873 = vperm.xlu0 %1779, %v2035_v20   ;;  %v2118_v42 = vpop.xlane.xlu1 %321 }
  0xa4   : > { %1763 = vset.pattern.permute.xlu1 %v1897_v29  ;;  %691 = vperm.xlu2 %1762, %v1997_v1   ;;  %v2110_v41 = vpop.xlane.xlu0 %318  ;;  %vm350_vm9 = vcmp.eq.s32.totalorder %v328_v36, %v2126_v45  ;;  %vm351_vm10 = vcmp.eq.s32.totalorder %v328_v36, %v2135_v47 }
  0xa5   : > { %694 = vperm.xlu1 %1763, %v2009_v4   ;;  %v1467_v51 = vsel %vm350_vm9, 1.0, %v1893_v7  ;;  %v1468_v52 = vsel %vm351_vm10, 1.0, %v1893_v7 }
  0xab   : > { %v2101_v39 = vpop.permute.xlu2 %336  ;;  %1788 = vset.pattern.permute.xlu0 %v1900_v40 }
  0xac   : > { %1765 = vset.pattern.permute.xlu2 %v1896_v28  ;;  %964 = vperm.xlu0 %1788, %v2030_v17   ;;  %vm356_vm1 = vcmp.eq.s32.totalorder %v2101_v39, %v2126_v45  ;;  %vm357_vm2 = vcmp.eq.s32.totalorder %v2101_v39, %v2135_v47 }
  0xad   : > { %1766 = vset.pattern.permute.xlu1 %v1899_v33  ;;  %782 = vperm.xlu2 %1765, %v2009_v4   ;;  %v1473_v8 = vsel %vm356_vm1, 1.0, %v1893_v7  ;;  %v1474_v9 = vsel %vm357_vm2, 1.0, %v1893_v7 }
  0xae   : > { %867 = vperm.xlu1 %1766, %v1997_v1  }
  0xb3   : > { %v2120_v44 = vpop.permute.xlu2 %339 }
  0xb4   : > { %949 = vperm.xlu0 %1788, %v2000_v2  }
  0xb5   : > { %1767 = vset.pattern.permute.xlu2 %v1899_v33 }
  0xb6   : > { %1768 = vset.pattern.permute.xlu1 %v1897_v29  ;;  %870 = vperm.xlu2 %1767, %v2009_v4  }
  0xb7   : > { %679 = vperm.xlu1 %1768, %v2003_v3   ;;  %v331_v46 = vpop.permute.xlu0 %330 }
  0xb8   : > { %vm352_vm11 = vcmp.eq.s32.totalorder %v331_v46, %v2126_v45  ;;  %vm353_vm12 = vcmp.eq.s32.totalorder %v331_v46, %v2135_v47 }
  0xb9   : > { %v1469_v55 = vsel %vm352_vm11, 1.0, %v1893_v7  ;;  %v1470_v56 = vsel %vm353_vm12, 1.0, %v1893_v7 }
  0xbb   : > { %v334_v48 = vpop.permute.xlu1 %333  ;;  %v346_v49 = vpop.permute.xlu2 %345 }
  0xbc   : > { %vm354_vm5 = vcmp.eq.s32.totalorder %v334_v48, %v2126_v45  ;;  %vm355_vm6 = vcmp.eq.s32.totalorder %v334_v48, %v2135_v47  ;;  %vm362_vm7 = vcmp.eq.s32.totalorder %v346_v49, %v2126_v45  ;;  %vm363_vm8 = vcmp.eq.s32.totalorder %v346_v49, %v2135_v47 }
  0xbd   : > { %v1471_v14 = vsel %vm354_vm5, 1.0, %v1893_v7  ;;  %v1472_v15 = vsel %vm355_vm6, 1.0, %v1893_v7  ;;  %v1479_v18 = vsel %vm362_vm7, 1.0, %v1893_v7  ;;  %v1480_v19 = vsel %vm363_vm8, 1.0, %v1893_v7 }
  0xbe   : > { %1771 = vset.pattern.permute.xlu2 %v1900_v40 }
  0xbf   : > { %1772 = vset.pattern.permute.xlu1 %v1900_v40  ;;  %955 = vperm.xlu2 %1771, %v1997_v1  }
  0xc0   : > { %v416_v50 = vpop.permute.xlu0 %415  ;;  %958 = vperm.xlu1 %1772, %v2009_v4  }
  0xc1   : > { %vm438_vm13 = vcmp.eq.s32.totalorder %v416_v50, %v2126_v45  ;;  %vm439_vm14 = vcmp.eq.s32.totalorder %v416_v50, %v2135_v47 }
  0xc2   : > { %v1483_v53 = vsel %vm438_vm13, 1.0, %v1893_v7  ;;  %v1484_v54 = vsel %vm439_vm14, 1.0, %v1893_v7  ;;  %vm358_vm13 = vcmp.eq.s32.totalorder %v2120_v44, %v2126_v45  ;;  %vm359_vm14 = vcmp.eq.s32.totalorder %v2120_v44, %v2135_v47 }
  0xc3   : > { %v2153_v57 = vadd.f32 %v1483_v53, %v1467_v51  ;;  %v2155_v58 = vadd.f32 %v1484_v54, %v1468_v52  ;;  %v2157_v59 = vpop.permute.xlu1 %342  ;;  %v419_v60 = vpop.permute.xlu2 %418  ;;  %v1475_v43 = vsel %vm358_vm13, 1.0, %v1893_v7  ;;  %v1476_v46 = vsel %vm359_vm14, 1.0, %v1893_v7 }
  0xc4   : > { %vm440_vm15 = vcmp.eq.s32.totalorder %v419_v60, %v2126_v45  ;;  %vm441_vm0 = vcmp.eq.s32.totalorder %v419_v60, %v2135_v47 }
  0xc5   : > { %v1485_v61 = vsel %vm440_vm15, 1.0, %v1893_v7  ;;  %v1486_v62 = vsel %vm441_vm0, 1.0, %v1893_v7 }
  0xc6   : > { %v488_v63 = vadd.f32 %v1485_v61, %v1469_v55  ;;  %v489_v0 = vadd.f32 %v1486_v62, %v1470_v56 }
  0xc7   : > { %1773 = vset.pattern.permute.xlu2 %v1896_v28 }
  0xc8   : > { %1774 = vset.pattern.permute.xlu1 %v1896_v28  ;;  %767 = vperm.xlu2 %1773, %v2003_v3   ;;  %v2245_v61 = vpop.permute.xlu0 %430 }
  0xc9   : > { %770 = vperm.xlu1 %1774, %v2015_v6  }
  0xcb   : > { %v2171_v1 = vpop.permute.xlu1 %348  ;;  %v425_v4 = vpop.permute.xlu2 %424 }
  0xcc   : > { %vm444_vm3 = vcmp.eq.s32.totalorder %v425_v4, %v2126_v45  ;;  %vm445_vm4 = vcmp.eq.s32.totalorder %v425_v4, %v2135_v47 }
  0xcd   : > { %v1489_v10 = vsel %vm444_vm3, 1.0, %v1893_v7  ;;  %v1490_v11 = vsel %vm445_vm4, 1.0, %v1893_v7  ;;  %vm364_vm3 = vcmp.eq.s32.totalorder %v2171_v1, %v2126_v45  ;;  %vm365_vm4 = vcmp.eq.s32.totalorder %v2171_v1, %v2135_v47 }
  0xce   : > { %v2179_v12 = vadd.f32 %v1489_v10, %v1473_v8  ;;  %v2181_v13 = vadd.f32 %v1490_v11, %v1474_v9  ;;  %v1481_v55 = vsel %vm364_vm3, 1.0, %v1893_v7  ;;  %v1482_v56 = vsel %vm365_vm4, 1.0, %v1893_v7 }
  0xcf   : > { %vm448_vm3 = vcmp.eq.s32.totalorder %v2245_v61, %v2126_v45  ;;  %vm449_vm4 = vcmp.eq.s32.totalorder %v2245_v61, %v2135_v47 }
  0xd0   : > { %1775 = vset.pattern.permute.xlu2 %v1899_v33 }
  0xd1   : > { %1776 = vset.pattern.permute.xlu1 %v1900_v40  ;;  %858 = vperm.xlu2 %1775, %v2015_v6  }
  0xd2   : > { %943 = vperm.xlu1 %1776, %v2003_v3  }
  0xd3   : > { %v434_v16 = vpop.permute.xlu2 %433 }
  0xd4   : > { %vm450_vm9 = vcmp.eq.s32.totalorder %v434_v16, %v2126_v45  ;;  %vm451_vm10 = vcmp.eq.s32.totalorder %v434_v16, %v2135_v47  ;;  %v422_v21 = vpop.permute.xlu1 %421 }
  0xd5   : > { %v1495_v22 = vsel %vm450_vm9, 1.0, %v1893_v7  ;;  %v1496_v23 = vsel %vm451_vm10, 1.0, %v1893_v7  ;;  %vm442_vm11 = vcmp.eq.s32.totalorder %v422_v21, %v2126_v45  ;;  %vm443_vm12 = vcmp.eq.s32.totalorder %v422_v21, %v2135_v47 }
  0xd6   : > { %v498_v3 = vadd.f32 %v1495_v22, %v1479_v18  ;;  %v499_v24 = vadd.f32 %v1496_v23, %v1480_v19  ;;  %v1487_v25 = vsel %vm442_vm11, 1.0, %v1893_v7  ;;  %v1488_v26 = vsel %vm443_vm12, 1.0, %v1893_v7  ;;  %v2269_v18 = vpop.permute.xlu0 %503 }
  0xd7   : > { %v2203_v27 = vadd.f32 %v1487_v25, %v1471_v14  ;;  %v2205_v36 = vadd.f32 %v1488_v26, %v1472_v15  ;;  %v1673_v26 = vld [vmem:[%s2747_s2 + $0x38] sm:$0xff] }
  0xd8   : > { %1683 = vmatpush.bf16.msra.mxu2 %v1673_v26  ;;  %1166 = vmatpush.bf16.msra.mxu0 %v1673_v26 }
  0xd9   : > { %1777 = vset.pattern.permute.xlu2 %v1900_v40 }
  0xda   : > { %1778 = vset.pattern.permute.xlu1 %v1898_v30  ;;  %946 = vperm.xlu2 %1777, %v2015_v6  }
  0xdb   : > { %609 = vperm.xlu1 %1778, %v2035_v20   ;;  %v507_v39 = vpop.permute.xlu2 %506 }
  0xdc   : > { %vm528_vm15 = vcmp.eq.s32.totalorder %v507_v39, %v2126_v45  ;;  %vm529_vm0 = vcmp.eq.s32.totalorder %v507_v39, %v2135_v47  ;;  %v428_v48 = vpop.permute.xlu1 %427 }
  0xdd   : > { %v1501_v44 = vsel %vm528_vm15, 1.0, %v1893_v7  ;;  %v1502_v49 = vsel %vm529_vm0, 1.0, %v1893_v7  ;;  %vm446_vm1 = vcmp.eq.s32.totalorder %v428_v48, %v2126_v45  ;;  %vm447_vm2 = vcmp.eq.s32.totalorder %v428_v48, %v2135_v47  ;;  %v1680_v48 = vld [vmem:[%s2747_s2 + $0x70] sm:$0xff] }
  0xde   : > { %v2223_v6 = vadd.f32 %v1501_v44, %v488_v63  ;;  %v2225_v30 = vadd.f32 %v1502_v49, %v489_v0  ;;  %v1491_v50 = vsel %vm446_vm1, 1.0, %v1893_v7  ;;  %v1492_v51 = vsel %vm447_vm2, 1.0, %v1893_v7 }
  0xdf   : > { %v2229_v52 = vadd.f32 %v1491_v50, %v1475_v43  ;;  %v2231_v53 = vadd.f32 %v1492_v51, %v1476_v46  ;;  %v1672_v46 = vld [vmem:[%s2747_s2 + $0x30] sm:$0xff] }
  0xe0   : > { %1684 = vmatpush.bf16.msra.mxu2 %v1672_v46  ;;  %1167 = vmatpush.bf16.msra.mxu0 %v1672_v46 }
  0xe2   : > { %1780 = vset.pattern.permute.xlu2 %v1897_v29 }
  0xe3   : > { %1781 = vset.pattern.permute.xlu1 %v1897_v29  ;;  %697 = vperm.xlu2 %1780, %v2035_v20   ;;  %v513_v54 = vpop.permute.xlu2 %512 }
  0xe4   : > { %vm532_vm5 = vcmp.eq.s32.totalorder %v513_v54, %v2126_v45  ;;  %vm533_vm6 = vcmp.eq.s32.totalorder %v513_v54, %v2135_v47  ;;  %v437_v60 = vpop.permute.xlu1 %436  ;;  %700 = vperm.xlu1 %1781, %v2030_v17  }
  0xe5   : > { %v1505_v62 = vsel %vm532_vm5, 1.0, %v1893_v7  ;;  %v1506_v63 = vsel %vm533_vm6, 1.0, %v1893_v7  ;;  %vm452_vm7 = vcmp.eq.s32.totalorder %v437_v60, %v2126_v45  ;;  %vm453_vm8 = vcmp.eq.s32.totalorder %v437_v60, %v2135_v47  ;;  %v1679_v60 = vld [vmem:[%s2747_s2 + $0x68] sm:$0xff] }
  0xe6   : > { %v580_v0 = vadd.f32 %v1505_v62, %v2179_v12  ;;  %v581_v1 = vadd.f32 %v1506_v63, %v2181_v13  ;;  %v1497_v4 = vsel %vm452_vm7, 1.0, %v1893_v7  ;;  %v1498_v8 = vsel %vm453_vm8, 1.0, %v1893_v7 }
  0xe7   : > { %v500_v9 = vadd.f32 %v1497_v4, %v1481_v55  ;;  %v501_v10 = vadd.f32 %v1498_v8, %v1482_v56  ;;  %v1671_v56 = vld [vmem:[%s2747_s2 + $0x28] sm:$0xff]  ;;  %vm360_vm5 = vcmp.eq.s32.totalorder %v2157_v59, %v2126_v45  ;;  %vm361_vm6 = vcmp.eq.s32.totalorder %v2157_v59, %v2135_v47 }
  0xe8   : > { %1685 = vmatpush.bf16.msra.mxu2 %v1671_v56  ;;  %1168 = vmatpush.bf16.msra.mxu0 %v1671_v56 }
  0xeb   : > { %1782 = vset.pattern.permute.xlu2 %v1896_v28  ;;  %v522_v11 = vpop.permute.xlu2 %521 }
  0xec   : > { %vm538_vm9 = vcmp.eq.s32.totalorder %v522_v11, %v2126_v45  ;;  %vm539_vm10 = vcmp.eq.s32.totalorder %v522_v11, %v2135_v47  ;;  %1783 = vset.pattern.permute.xlu1 %v1896_v28  ;;  %785 = vperm.xlu2 %1782, %v2035_v20   ;;  %v1677_v11 = vld [vmem:[%s2747_s2 + $0x58] sm:$0xff] }
  0xed   : > { %v1511_v14 = vsel %vm538_vm9, 1.0, %v1893_v7  ;;  %v1512_v12 = vsel %vm539_vm10, 1.0, %v1893_v7  ;;  %v510_v13 = vpop.permute.xlu1 %509  ;;  %788 = vperm.xlu1 %1783, %v2030_v17  }
  0xee   : > { %v2263_v15 = vadd.f32 %v1511_v14, %v498_v3  ;;  %v2265_v16 = vadd.f32 %v1512_v12, %v499_v24  ;;  %vm530_vm11 = vcmp.eq.s32.totalorder %v510_v13, %v2126_v45  ;;  %vm531_vm12 = vcmp.eq.s32.totalorder %v510_v13, %v2135_v47  ;;  %v2283_v24 = vpop.permute.xlu0 %518  ;;  %v1668_v13 = vld [vmem:[%s2747_s2 + $0x10] sm:$0xff] }
  0xef   : > { %v1503_v19 = vsel %vm530_vm11, 1.0, %v1893_v7  ;;  %v1504_v21 = vsel %vm531_vm12, 1.0, %v1893_v7  ;;  %vm536_vm9 = vcmp.eq.s32.totalorder %v2283_v24, %v2126_v45  ;;  %vm537_vm10 = vcmp.eq.s32.totalorder %v2283_v24, %v2135_v47 }
  0xf0   : > { %v578_v22 = vadd.f32 %v1503_v19, %v2203_v27  ;;  %v579_v23 = vadd.f32 %v1504_v21, %v2205_v36  ;;  %v1681_v27 = vld [vmem:[%s2747_s2 + $0x78] sm:$0xff]  ;;  %v1676_v19 = vld [vmem:[%s2747_s2 + $0x50] sm:$0xff]  ;;  %v1667_v21 = vld [vmem:[%s2747_s2 + $0x8] sm:$0xff]  ;;  %v1509_v24 = vsel %vm536_vm9, 1.0, %v1893_v7  ;;  %vm526_vm9 = vcmp.eq.s32.totalorder %v2269_v18, %v2126_v45 }
  0xf1   : > { %1691 = vmatpush.bf16.msra.mxu3 %v1681_v27  ;;  %1195 = vmatpush.bf16.msra.mxu1 %v1681_v27  ;;  %v1674_v27 = vld [vmem:[%s2747_s2 + $0x40] sm:$0xff] }
  0xf3   : > { %v2275_v25 = vpop.permute.xlu2 %594 }
  0xf4   : > { %1784 = vset.pattern.permute.xlu2 %v1899_v33 }
  0xf5   : > { %v2278_v3 = vpop.permute.xlu1 %515  ;;  %1785 = vset.pattern.permute.xlu1 %v1897_v29  ;;  %876 = vperm.xlu2 %1784, %v2030_v17  }
  0xf6   : > { %685 = vperm.xlu1 %1785, %v2000_v2   ;;  %v2313_v54 = vpop.permute.xlu0 %779  ;;  %1692 = vmatpush.bf16.msra.mxu3 %v1680_v48  ;;  %vm534_vm7 = vcmp.eq.s32.totalorder %v2278_v3, %v2126_v45  ;;  %vm535_vm8 = vcmp.eq.s32.totalorder %v2278_v3, %v2135_v47  ;;  %v1477_v3 = vsel %vm360_vm5, 1.0, %v1893_v7 }
  0xf7   : > { %1196 = vmatpush.bf16.msra.mxu1 %v1680_v48 }
  0xfa   : > { %1693 = vmatpush.bf16.msra.mxu3 %v1679_v60 }
  0xfb   : > { %v601_v36 = vpop.permute.xlu2 %600  ;;  %1197 = vmatpush.bf16.msra.mxu1 %v1679_v60 }
  0xfc   : > { %vm620_vm13 = vcmp.eq.s32.totalorder %v601_v36, %v2126_v45  ;;  %vm621_vm14 = vcmp.eq.s32.totalorder %v601_v36, %v2135_v47 }
  0xfd   : > { %v1521_v17 = vsel %vm620_vm13, 1.0, %v1893_v7  ;;  %v1522_v39 = vsel %vm621_vm14, 1.0, %v1893_v7  ;;  %v525_v43 = vpop.permute.xlu1 %524  ;;  %1786 = vset.pattern.permute.xlu2 %v1897_v29 }
  0xfe   : > { %v2301_v44 = vadd.f32 %v1521_v17, %v580_v0  ;;  %v2303_v49 = vadd.f32 %v1522_v39, %v581_v1  ;;  %1787 = vset.pattern.permute.xlu1 %v1900_v40  ;;  %vm540_vm15 = vcmp.eq.s32.totalorder %v525_v43, %v2126_v45  ;;  %vm541_vm0 = vcmp.eq.s32.totalorder %v525_v43, %v2135_v47  ;;  %v1678_v0 = vld [vmem:[%s2747_s2 + $0x60] sm:$0xff] }
  0xff   : > { %688 = vperm.xlu2 %1786, %v2012_v5   ;;  %v1513_v50 = vsel %vm540_vm15, 1.0, %v1893_v7  ;;  %v1514_v51 = vsel %vm541_vm0, 1.0, %v1893_v7  ;;  %961 = vperm.xlu1 %1787, %v2035_v20   ;;  %v1670_v20 = vld [vmem:[%s2747_s2 + $0x20] sm:$0xff]  ;;  %v1478_v17 = vsel %vm361_vm6, 1.0, %v1893_v7  ;;  %v1507_v39 = vsel %vm534_vm7, 1.0, %v1893_v7 }
 0x100   : > { %v2315_v55 = vadd.f32 %v1513_v50, %v500_v9  ;;  %v2317_v29 = vadd.f32 %v1514_v51, %v501_v10  ;;  %1686 = vmatpush.bf16.msra.mxu2 %v1670_v20  ;;  %v1669_v10 = vld [vmem:[%s2747_s2 + $0x18] sm:$0xff]  ;;  %1694 = vmatpush.bf16.msra.mxu3 %v1678_v0  ;;  %v1508_v43 = vsel %vm535_vm8, 1.0, %v1893_v7  ;;  %v1510_v50 = vsel %vm537_vm10, 1.0, %v1893_v7 }
 0x101   : > { %1169 = vmatpush.bf16.msra.mxu0 %v1670_v20  ;;  %1198 = vmatpush.bf16.msra.mxu1 %v1678_v0  ;;  %v582_v60 = vadd.f32 %v1507_v39, %v2229_v52  ;;  %v583_v20 = vadd.f32 %v1508_v43, %v2231_v53  ;;  %vm527_vm10 = vcmp.eq.s32.totalorder %v2269_v18, %v2135_v47 }
 0x103   : > { %v2325_v62 = vpop.permute.xlu2 %691 }
 0x104   : > { %1687 = vmatpush.bf16.msra.mxu2 %v1669_v10  ;;  %1695 = vmatpush.bf16.msra.mxu3 %v1677_v11  ;;  %vm710_vm15 = vcmp.eq.s32.totalorder %v2325_v62, %v2126_v45  ;;  %vm711_vm0 = vcmp.eq.s32.totalorder %v2325_v62, %v2135_v47 }
 0x105   : > { %1170 = vmatpush.bf16.msra.mxu0 %v1669_v10  ;;  %1199 = vmatpush.bf16.msra.mxu1 %v1677_v11  ;;  %v1539_v53 = vsel %vm710_vm15, 1.0, %v1893_v7  ;;  %v1540_v62 = vsel %vm711_vm0, 1.0, %v1893_v7 }
 0x106   : > { %v598_v63 = vpop.permute.xlu1 %597 }
 0x107   : > { %vm618_vm1 = vcmp.eq.s32.totalorder %v598_v63, %v2126_v45  ;;  %vm619_vm2 = vcmp.eq.s32.totalorder %v598_v63, %v2135_v47  ;;  %1789 = vset.pattern.permute.xlu2 %v1896_v28  ;;  %1790 = vset.pattern.permute.xlu1 %v1896_v28  ;;  %v2351_v28 = vpop.permute.xlu0 %682 }
 0x108   : > { %v1519_v1 = vsel %vm618_vm1, 1.0, %v1893_v7  ;;  %v1520_v4 = vsel %vm619_vm2, 1.0, %v1893_v7  ;;  %773 = vperm.xlu2 %1789, %v2000_v2   ;;  %776 = vperm.xlu1 %1790, %v2012_v5  }
 0x109   : > { %v2340_v8 = vadd.f32 %v1519_v1, %v578_v22  ;;  %v2342_v9 = vadd.f32 %v1520_v4, %v579_v23  ;;  %1688 = vmatpush.bf16.msra.mxu2 %v1668_v13  ;;  %1696 = vmatpush.bf16.msra.mxu3 %v1676_v19  ;;  %v1675_v22 = vld [vmem:[%s2747_s2 + $0x48] sm:$0xff] }
 0x10a   : > { %1171 = vmatpush.bf16.msra.mxu0 %v1668_v13  ;;  %1200 = vmatpush.bf16.msra.mxu1 %v1676_v19 }
 0x10b   : > { %v2353_v14 = vpop.permute.xlu2 %782 }
 0x10c   : > { %vm800_vm5 = vcmp.eq.s32.totalorder %v2353_v14, %v2126_v45  ;;  %vm801_vm6 = vcmp.eq.s32.totalorder %v2353_v14, %v2135_v47 }
 0x10d   : > { %1689 = vmatpush.bf16.msra.mxu2 %v1667_v21  ;;  %1697 = vmatpush.bf16.msra.mxu3 %v1675_v22  ;;  %v1557_v14 = vsel %vm800_vm5, 1.0, %v1893_v7 }
 0x10e   : > { %v604_v12 = vpop.permute.xlu1 %603  ;;  %1172 = vmatpush.bf16.msra.mxu0 %v1667_v21  ;;  %1201 = vmatpush.bf16.msra.mxu1 %v1675_v22 }
 0x10f   : > { %v2371_v23 = vpop.permute.xlu0 %591  ;;  %vm622_vm11 = vcmp.eq.s32.totalorder %v604_v12, %v2126_v45  ;;  %vm623_vm12 = vcmp.eq.s32.totalorder %v604_v12, %v2135_v47 }
 0x110   : > { %1791 = vset.pattern.permute.xlu2 %v1899_v33  ;;  %1792 = vset.pattern.permute.xlu1 %v1899_v33  ;;  %v1523_v51 = vsel %vm622_vm11, 1.0, %v1893_v7  ;;  %v1524_v56 = vsel %vm623_vm12, 1.0, %v1893_v7  ;;  %vm616_vm11 = vcmp.eq.s32.totalorder %v2275_v25, %v2126_v45  ;;  %vm617_vm12 = vcmp.eq.s32.totalorder %v2275_v25, %v2135_v47 }
 0x111   : > { %861 = vperm.xlu2 %1791, %v2000_v2   ;;  %864 = vperm.xlu1 %1792, %v2012_v5   ;;  %v1666_v2 = vld [vmem:[%s2747_s2] sm:$0xff]  ;;  %v670_v10 = vadd.f32 %v1523_v51, %v582_v60  ;;  %v671_v52 = vadd.f32 %v1524_v56, %v583_v20  ;;  %v1517_v56 = vsel %vm616_vm11, 1.0, %v1893_v7  ;;  %v1518_v18 = vsel %vm617_vm12, 1.0, %v1893_v7 }
 0x112   : > { %1690 = vmatpush.bf16.msra.mxu2 %v1666_v2  ;;  %1698 = vmatpush.bf16.msra.mxu3 %v1674_v27  ;;  %vm614_vm5 = vcmp.eq.s32.totalorder %v2371_v23, %v2126_v45 }
 0x113   : > { %v2373_v26 = vpop.permute.xlu2 %870  ;;  %1173 = vmatpush.bf16.msra.mxu0 %v1666_v2  ;;  %1202 = vmatpush.bf16.msra.mxu1 %v1674_v27  ;;  %v758_v2 = vadd.f32 %v1539_v53, %v670_v10 }
 0x117   : > { %v695_v33 = vpop.permute.xlu1 %694  ;;  %v607_v61 = vpop.permute.xlu0 %606 }
 0x118   : > { %vm624_vm13 = vcmp.eq.s32.totalorder %v607_v61, %v2126_v45  ;;  %vm625_vm14 = vcmp.eq.s32.totalorder %v607_v61, %v2135_v47  ;;  %vm712_vm1 = vcmp.eq.s32.totalorder %v695_v33, %v2126_v45  ;;  %vm713_vm2 = vcmp.eq.s32.totalorder %v695_v33, %v2135_v47 }
 0x119   : > { %1793 = vset.pattern.permute.xlu2 %v1900_v40  ;;  %v1494_v40 = vsel %vm449_vm4, 1.0, %v1893_v7  ;;  %v1525_v1 = vsel %vm624_vm13, 1.0, %v1893_v7  ;;  %v1526_v4 = vsel %vm625_vm14, 1.0, %v1893_v7  ;;  %vm799_vm4 = vcmp.eq.s32.totalorder %v2313_v54, %v2135_v47 }
 0x11a   : > { %952 = vperm.xlu2 %1793, %v2012_v5   ;;  %v1493_v5 = vsel %vm448_vm3, 1.0, %v1893_v7  ;;  %v497_v48 = vadd.f32 %v1494_v40, %v1478_v17  ;;  %vm798_vm3 = vcmp.eq.s32.totalorder %v2313_v54, %v2126_v45  ;;  %v1541_v11 = vsel %vm712_vm1, 1.0, %v1893_v7 }
 0x11b   : > { %v2403_v36 = vpop.permute.xlu2 %955  ;;  %v496_v46 = vadd.f32 %v1493_v5, %v1477_v3  ;;  %v1542_v12 = vsel %vm713_vm2, 1.0, %v1893_v7  ;;  %v1555_v54 = vsel %vm798_vm3, 1.0, %v1893_v7  ;;  %v1556_v22 = vsel %vm799_vm4, 1.0, %v1893_v7 }
 0x11c   : > { %v585_v0 = vadd.f32 %v1510_v50, %v497_v48  ;;  %v759_v33 = vadd.f32 %v1540_v62, %v671_v52  ;;  %v1558_v61 = vsel %vm801_vm6, 1.0, %v1893_v7  ;;  %vm888_vm13 = vcmp.eq.s32.totalorder %v2373_v26, %v2126_v45 }
 0x11d   : > { %v584_v63 = vadd.f32 %v1509_v24, %v496_v46  ;;  %vm889_vm14 = vcmp.eq.s32.totalorder %v2373_v26, %v2135_v47  ;;  %vm974_vm15 = vcmp.eq.s32.totalorder %v2403_v36, %v2126_v45  ;;  %vm975_vm0 = vcmp.eq.s32.totalorder %v2403_v36, %v2135_v47 }
 0x11e   : > { %v673_v19 = vadd.f32 %v1526_v4, %v585_v0  ;;  %v847_v3 = vadd.f32 %v1556_v22, %v759_v33  ;;  %v1499_v48 = vsel %vm526_vm9, 1.0, %v1893_v7  ;;  %v1500_v26 = vsel %vm527_vm10, 1.0, %v1893_v7 }
 0x11f   : > { %v672_v13 = vadd.f32 %v1525_v1, %v584_v63  ;;  %v1573_v24 = vsel %vm888_vm13, 1.0, %v1893_v7  ;;  %v1574_v50 = vsel %vm889_vm14, 1.0, %v1893_v7  ;;  %vm704_vm1 = vcmp.eq.s32.totalorder %v2351_v28, %v2126_v45  ;;  %v2495_v4 = vpop.permute.xlu0 %612 }
 0x120   : > { %v868_v59 = vpop.permute.xlu1 %867  ;;  %v761_v40 = vadd.f32 %v1542_v12, %v673_v19  ;;  %vm705_vm2 = vcmp.eq.s32.totalorder %v2351_v28, %v2135_v47  ;;  %v1587_v60 = vsel %vm974_vm15, 1.0, %v1893_v7  ;;  %v1588_v20 = vsel %vm975_vm0, 1.0, %v1893_v7 }
 0x121   : > { %v760_v5 = vadd.f32 %v1541_v11, %v672_v13  ;;  %vm886_vm7 = vcmp.eq.s32.totalorder %v868_v59, %v2126_v45  ;;  %vm887_vm8 = vcmp.eq.s32.totalorder %v868_v59, %v2135_v47  ;;  %v846_v59 = vadd.f32 %v1555_v54, %v758_v2 }
 0x122   : > { %v1571_v17 = vsel %vm886_vm7, 1.0, %v1893_v7  ;;  %v1572_v39 = vsel %vm887_vm8, 1.0, %v1893_v7  ;;  %v849_v46 = vadd.f32 %v1558_v61, %v761_v40  ;;  %vm615_vm6 = vcmp.eq.s32.totalorder %v2371_v23, %v2135_v47 }
 0x123   : > { %v2441_v27 = vpop.permute.xlu2 %767  ;;  %v848_v43 = vadd.f32 %v1557_v14, %v760_v5  ;;  %v934_v36 = vadd.f32 %v1571_v17, %v846_v59  ;;  %v935_v51 = vadd.f32 %v1572_v39, %v847_v3  ;;  %v664_v13 = vadd.f32 %v1517_v56, %v2223_v6 }
 0x124   : > { %v937_v1 = vadd.f32 %v1574_v50, %v849_v46  ;;  %v665_v19 = vadd.f32 %v1518_v18, %v2225_v30  ;;  %v1515_v23 = vsel %vm614_vm5, 1.0, %v1893_v7  ;;  %v1516_v54 = vsel %vm615_vm6, 1.0, %v1893_v7 }
 0x125   : > { %v936_v0 = vadd.f32 %v1573_v24, %v848_v43  ;;  %v1022_v53 = vadd.f32 %v1587_v60, %v934_v36  ;;  %v1023_v11 = vadd.f32 %v1588_v20, %v935_v51  ;;  %v574_v33 = vadd.f32 %v1499_v48, %v2153_v57 }
 0x126   : > { %v575_v5 = vadd.f32 %v1500_v26, %v2155_v58  ;;  %v1533_v6 = vsel %vm704_vm1, 1.0, %v1893_v7  ;;  %v1534_v30 = vsel %vm705_vm2, 1.0, %v1893_v7  ;;  %vm790_vm9 = vcmp.eq.s32.totalorder %v2441_v27, %v2126_v45 }
 0x127   : > { %v662_v14 = vadd.f32 %v1515_v23, %v574_v33  ;;  %vm791_vm10 = vcmp.eq.s32.totalorder %v2441_v27, %v2135_v47  ;;  %v752_v61 = vadd.f32 %v1533_v6, %v664_v13  ;;  %v753_v59 = vadd.f32 %v1534_v30, %v665_v19  ;;  %v856_v17 = vpop.permute.xlu0 %855 }
 0x128   : > { %v663_v57 = vadd.f32 %v1516_v54, %v575_v5  ;;  %v1547_v27 = vsel %vm790_vm9, 1.0, %v1893_v7  ;;  %v1548_v46 = vsel %vm791_vm10, 1.0, %v1893_v7  ;;  %vm878_vm15 = vcmp.eq.s32.totalorder %v856_v17, %v2126_v45 }
 0x129   : > { %v2437_v21 = vpop.permute.xlu1 %679  ;;  %vm879_vm0 = vcmp.eq.s32.totalorder %v856_v17, %v2135_v47  ;;  %v1563_v18 = vsel %vm878_vm15, 1.0, %v1893_v7 }
 0x12a   : > { %vm702_vm7 = vcmp.eq.s32.totalorder %v2437_v21, %v2126_v45  ;;  %vm703_vm8 = vcmp.eq.s32.totalorder %v2437_v21, %v2135_v47  ;;  %v1564_v60 = vsel %vm879_vm0, 1.0, %v1893_v7 }
 0x12b   : > { %v859_v25 = vpop.permute.xlu2 %858  ;;  %v1531_v21 = vsel %vm702_vm7, 1.0, %v1893_v7  ;;  %v1532_v40 = vsel %vm703_vm8, 1.0, %v1893_v7  ;;  %vm628_vm7 = vcmp.eq.s32.totalorder %v2495_v4, %v2126_v45  ;;  %vm629_vm8 = vcmp.eq.s32.totalorder %v2495_v4, %v2135_v47 }
 0x12c   : > { %v750_v3 = vadd.f32 %v1531_v21, %v662_v14  ;;  %v751_v28 = vadd.f32 %v1532_v40, %v663_v57  ;;  %vm880_vm13 = vcmp.eq.s32.totalorder %v859_v25, %v2126_v45  ;;  %vm881_vm14 = vcmp.eq.s32.totalorder %v859_v25, %v2135_v47 }
 0x12d   : > { %v1565_v50 = vsel %vm880_vm13, 1.0, %v1893_v7  ;;  %v1566_v36 = vsel %vm881_vm14, 1.0, %v1893_v7  ;;  %v1529_v57 = vsel %vm628_vm7, 1.0, %v1893_v7 }
 0x12e   : > { %v838_v51 = vadd.f32 %v1547_v27, %v750_v3  ;;  %v839_v56 = vadd.f32 %v1548_v46, %v751_v28  ;;  %v676_v27 = vadd.f32 %v1529_v57, %v2315_v55 }
 0x12f   : > { %v874_v14 = vpop.permute.xlu0 %873 }
 0x132   : > { %v959_v63 = vpop.permute.xlu1 %958 }
 0x133   : > { %vm976_vm3 = vcmp.eq.s32.totalorder %v959_v63, %v2126_v45  ;;  %vm977_vm4 = vcmp.eq.s32.totalorder %v959_v63, %v2135_v47 }
 0x134   : > { %v1589_v10 = vsel %vm976_vm3, 1.0, %v1893_v7  ;;  %v1590_v52 = vsel %vm977_vm4, 1.0, %v1893_v7  ;;  %v947_v48 = vpop.permute.xlu2 %946 }
 0x135   : > { %v1024_v62 = vadd.f32 %v1589_v10, %v936_v0  ;;  %v1025_v12 = vadd.f32 %v1590_v52, %v937_v1  ;;  %vm968_vm1 = vcmp.eq.s32.totalorder %v947_v48, %v2126_v45  ;;  %vm969_vm2 = vcmp.eq.s32.totalorder %v947_v48, %v2135_v47 }
 0x136   : > { %v1581_v0 = vsel %vm968_vm1, 1.0, %v1893_v7  ;;  %v1582_v1 = vsel %vm969_vm2, 1.0, %v1893_v7  ;;  %v926_v10 = vadd.f32 %v1563_v18, %v838_v51  ;;  %v927_v52 = vadd.f32 %v1564_v60, %v839_v56 }
 0x137   : > { %v1034_v22 = vpack.c.bf16 %v1024_v62, %v1022_v53  ;;  %v1035_v2 = vpack.c.bf16 %v1025_v12, %v1023_v11 }
 0x139   : > { %1184 = vmatmul.bf16.vlgmr.msra.gmra.mxu2 %v1034_v22  ;;  %1213 = vmatmul.bf16.vlgmr.msra.gmra.mxu3 %v1035_v2 }
 0x13b   : > { %v771_v58 = vpop.permute.xlu1 %770 }
 0x13c   : > { %vm792_vm11 = vcmp.eq.s32.totalorder %v771_v58, %v2126_v45  ;;  %vm793_vm12 = vcmp.eq.s32.totalorder %v771_v58, %v2135_v47  ;;  %v1530_v58 = vsel %vm629_vm8, 1.0, %v1893_v7 }
 0x13d   : > { %v1549_v39 = vsel %vm792_vm11, 1.0, %v1893_v7  ;;  %v1550_v43 = vsel %vm793_vm12, 1.0, %v1893_v7  ;;  %v698_v23 = vpop.permute.xlu2 %697  ;;  %v677_v46 = vadd.f32 %v1530_v58, %v2317_v29 }
 0x13e   : > { %v840_v26 = vadd.f32 %v1549_v39, %v752_v61  ;;  %v841_v24 = vadd.f32 %v1550_v43, %v753_v59  ;;  %vm714_vm9 = vcmp.eq.s32.totalorder %v698_v23, %v2126_v45  ;;  %vm715_vm10 = vcmp.eq.s32.totalorder %v698_v23, %v2135_v47 }
 0x13f   : > { %v1543_v3 = vsel %vm714_vm9, 1.0, %v1893_v7  ;;  %v1544_v28 = vsel %vm715_vm10, 1.0, %v1893_v7 }
 0x140   : > { %v928_v20 = vadd.f32 %v1565_v50, %v840_v26  ;;  %v929_v63 = vadd.f32 %v1566_v36, %v841_v24  ;;  %v965_v36 = vpop.permute.xlu0 %964 }
 0x142   : > { %v1016_v12 = vadd.f32 %v1581_v0, %v928_v20  ;;  %v1017_v19 = vadd.f32 %v1582_v1, %v929_v63 }
 0x144   : > { %v944_v25 = vpop.permute.xlu1 %943 }
 0x145   : > { %vm966_vm3 = vcmp.eq.s32.totalorder %v944_v25, %v2126_v45  ;;  %vm967_vm4 = vcmp.eq.s32.totalorder %v944_v25, %v2135_v47 }
 0x146   : > { %v1579_v53 = vsel %vm966_vm3, 1.0, %v1893_v7  ;;  %v1580_v62 = vsel %vm967_vm4, 1.0, %v1893_v7  ;;  %v786_v33 = vpop.permute.xlu2 %785  ;;  %vm890_vm3 = vcmp.eq.s32.totalorder %v874_v14, %v2126_v45  ;;  %vm891_vm4 = vcmp.eq.s32.totalorder %v874_v14, %v2135_v47 }
 0x147   : > { %v1014_v11 = vadd.f32 %v1579_v53, %v926_v10  ;;  %v1015_v13 = vadd.f32 %v1580_v62, %v927_v52  ;;  %vm802_vm15 = vcmp.eq.s32.totalorder %v786_v33, %v2126_v45  ;;  %vm803_vm0 = vcmp.eq.s32.totalorder %v786_v33, %v2135_v47 }
 0x148   : > { %v1559_v55 = vsel %vm802_vm15, 1.0, %v1893_v7  ;;  %v1560_v29 = vsel %vm803_vm0, 1.0, %v1893_v7  ;;  %v1575_v1 = vsel %vm890_vm3, 1.0, %v1893_v7  ;;  %v1576_v25 = vsel %vm891_vm4, 1.0, %v1893_v7 }
 0x149   : > { %v1030_v54 = vpack.c.bf16 %v1016_v12, %v1014_v11  ;;  %v1031_v22 = vpack.c.bf16 %v1017_v19, %v1015_v13 }
 0x14b   : > { %1174 = vmatmul.bf16.vlgmr.msra.gmra.mxu0 %v1030_v54  ;;  %1203 = vmatmul.bf16.vlgmr.msra.gmra.mxu1 %v1031_v22 }
 0x14d   : > { %v610_v2 = vpop.permute.xlu1 %609 }
 0x14e   : > { %vm626_vm5 = vcmp.eq.s32.totalorder %v610_v2, %v2126_v45  ;;  %vm627_vm6 = vcmp.eq.s32.totalorder %v610_v2, %v2135_v47 }
 0x14f   : > { %v877_v6 = vpop.permute.xlu2 %876  ;;  %v1527_v21 = vsel %vm626_vm5, 1.0, %v1893_v7  ;;  %v1528_v40 = vsel %vm627_vm6, 1.0, %v1893_v7  ;;  %vm980_vm5 = vcmp.eq.s32.totalorder %v965_v36, %v2126_v45  ;;  %vm981_vm6 = vcmp.eq.s32.totalorder %v965_v36, %v2135_v47 }
 0x150   : > { %v674_v4 = vadd.f32 %v1527_v21, %v2263_v15  ;;  %v675_v59 = vadd.f32 %v1528_v40, %v2265_v16  ;;  %vm892_vm1 = vcmp.eq.s32.totalorder %v877_v6, %v2126_v45  ;;  %vm893_vm2 = vcmp.eq.s32.totalorder %v877_v6, %v2135_v47 }
 0x151   : > { %v1577_v18 = vsel %vm892_vm1, 1.0, %v1893_v7  ;;  %v1578_v60 = vsel %vm893_vm2, 1.0, %v1893_v7  ;;  %v1593_v53 = vsel %vm980_vm5, 1.0, %v1893_v7  ;;  %v1594_v62 = vsel %vm981_vm6, 1.0, %v1893_v7 }
 0x152   : > { %v762_v48 = vadd.f32 %v1543_v3, %v674_v4  ;;  %v763_v26 = vadd.f32 %v1544_v28, %v675_v59  ;;  %v950_v3 = vpop.permute.xlu0 %949 }
 0x153   : > { %vm970_vm3 = vcmp.eq.s32.totalorder %v950_v3, %v2126_v45  ;;  %vm971_vm4 = vcmp.eq.s32.totalorder %v950_v3, %v2135_v47 }
 0x154   : > { %v850_v63 = vadd.f32 %v1559_v55, %v762_v48  ;;  %v851_v0 = vadd.f32 %v1560_v29, %v763_v26 }
 0x156   : > { %v701_v5 = vpop.permute.xlu1 %700  ;;  %v938_v12 = vadd.f32 %v1575_v1, %v850_v63  ;;  %v939_v13 = vadd.f32 %v1576_v25, %v851_v0 }
 0x157   : > { %vm716_vm11 = vcmp.eq.s32.totalorder %v701_v5, %v2126_v45  ;;  %vm717_vm12 = vcmp.eq.s32.totalorder %v701_v5, %v2135_v47 }
 0x158   : > { %v1545_v17 = vsel %vm716_vm11, 1.0, %v1893_v7  ;;  %v1546_v39 = vsel %vm717_vm12, 1.0, %v1893_v7 }
 0x159   : > { %v2559_v61 = vpop.permute.xlu2 %688  ;;  %v764_v24 = vadd.f32 %v1545_v17, %v676_v27  ;;  %v765_v50 = vadd.f32 %v1546_v39, %v677_v46 }
 0x15f   : > { %v789_v30 = vpop.permute.xlu1 %788 }
 0x160   : > { %vm804_vm13 = vcmp.eq.s32.totalorder %v789_v30, %v2126_v45  ;;  %vm805_vm14 = vcmp.eq.s32.totalorder %v789_v30, %v2135_v47 }
 0x161   : > { %v1561_v15 = vsel %vm804_vm13, 1.0, %v1893_v7  ;;  %v1562_v16 = vsel %vm805_vm14, 1.0, %v1893_v7  ;;  %vm708_vm13 = vcmp.eq.s32.totalorder %v2559_v61, %v2126_v45  ;;  %vm709_vm14 = vcmp.eq.s32.totalorder %v2559_v61, %v2135_v47 }
 0x162   : > { %v852_v51 = vadd.f32 %v1561_v15, %v764_v24  ;;  %v853_v56 = vadd.f32 %v1562_v16, %v765_v50  ;;  %v774_v20 = vpop.permute.xlu2 %773  ;;  %v1583_v24 = vsel %vm970_vm3, 1.0, %v1893_v7  ;;  %v1584_v50 = vsel %vm971_vm4, 1.0, %v1893_v7 }
 0x163   : > { %vm794_vm11 = vcmp.eq.s32.totalorder %v774_v20, %v2126_v45  ;;  %vm795_vm12 = vcmp.eq.s32.totalorder %v774_v20, %v2135_v47 }
 0x164   : > { %v940_v10 = vadd.f32 %v1577_v18, %v852_v51  ;;  %v941_v52 = vadd.f32 %v1578_v60, %v853_v56  ;;  %v1551_v4 = vsel %vm794_vm11, 1.0, %v1893_v7  ;;  %v1552_v59 = vsel %vm795_vm12, 1.0, %v1893_v7 }
 0x166   : > { %v1028_v22 = vadd.f32 %v1593_v53, %v940_v10  ;;  %v1029_v33 = vadd.f32 %v1594_v62, %v941_v52 }
 0x168   : > { %v686_v43 = vpop.permute.xlu1 %685 }
 0x169   : > { %vm706_vm9 = vcmp.eq.s32.totalorder %v686_v43, %v2126_v45  ;;  %vm707_vm10 = vcmp.eq.s32.totalorder %v686_v43, %v2135_v47 }
 0x16a   : > { %v1535_v21 = vsel %vm706_vm9, 1.0, %v1893_v7  ;;  %v1536_v40 = vsel %vm707_vm10, 1.0, %v1893_v7 }
 0x16b   : > { %v862_v30 = vpop.permute.xlu2 %861  ;;  %v754_v57 = vadd.f32 %v1535_v21, %v2340_v8  ;;  %v755_v58 = vadd.f32 %v1536_v40, %v2342_v9  ;;  %v1537_v8 = vsel %vm708_vm13, 1.0, %v1893_v7  ;;  %v1538_v9 = vsel %vm709_vm14, 1.0, %v1893_v7 }
 0x16c   : > { %vm882_vm15 = vcmp.eq.s32.totalorder %v862_v30, %v2126_v45  ;;  %vm883_vm0 = vcmp.eq.s32.totalorder %v862_v30, %v2135_v47  ;;  %v756_v15 = vadd.f32 %v1537_v8, %v2301_v44  ;;  %v757_v16 = vadd.f32 %v1538_v9, %v2303_v49 }
 0x16d   : > { %v842_v28 = vadd.f32 %v1551_v4, %v754_v57  ;;  %v843_v17 = vadd.f32 %v1552_v59, %v755_v58  ;;  %v1567_v39 = vsel %vm882_vm15, 1.0, %v1893_v7  ;;  %v1568_v43 = vsel %vm883_vm0, 1.0, %v1893_v7 }
 0x16e   : > { %v1230_v57 = vmax.f32 %v2110_v41, 1.0  ;;  %v1231_v58 = vmax.f32 %v2118_v42, 1.0  ;;  %v1226_v9 = vmax.f32 %v2090_v35, 1.0  ;;  %v1227_v41 = vmax.f32 %v2099_v38, 1.0 }
 0x16f   : > { %v930_v48 = vadd.f32 %v1567_v39, %v842_v28  ;;  %v931_v26 = vadd.f32 %v1568_v43, %v843_v17 }
 0x171   : > { %v962_v11 = vpop.permute.xlu1 %961  ;;  %v1018_v20 = vadd.f32 %v1583_v24, %v930_v48  ;;  %v1019_v63 = vadd.f32 %v1584_v50, %v931_v26 }
 0x172   : > { %vm978_vm7 = vcmp.eq.s32.totalorder %v962_v11, %v2126_v45  ;;  %vm979_vm8 = vcmp.eq.s32.totalorder %v962_v11, %v2135_v47 }
 0x173   : > { %v1591_v19 = vsel %vm978_vm7, 1.0, %v1893_v7  ;;  %v1592_v23 = vsel %vm979_vm8, 1.0, %v1893_v7 }
 0x174   : > { %v1026_v54 = vadd.f32 %v1591_v19, %v938_v12  ;;  %v1027_v2 = vadd.f32 %v1592_v23, %v939_v13  ;;  %v953_v61 = vpop.permute.xlu2 %952  ;;  %v1224_v12 = vmax.f32 %v2082_v32, 1.0 }
 0x175   : > { %vm972_vm5 = vcmp.eq.s32.totalorder %v953_v61, %v2126_v45  ;;  %vm973_vm6 = vcmp.eq.s32.totalorder %v953_v61, %v2135_v47 }
 0x176   : > { %v1036_v5 = vpack.c.bf16 %v1028_v22, %v1026_v54  ;;  %v1037_v6 = vpack.c.bf16 %v1029_v33, %v1027_v2  ;;  %v1585_v51 = vsel %vm972_vm5, 1.0, %v1893_v7  ;;  %v1586_v56 = vsel %vm973_vm6, 1.0, %v1893_v7 }
 0x178   : > { %1189 = vmatmul.bf16.gmra.mxu2 %v1036_v5  ;;  %1218 = vmatmul.bf16.gmra.mxu3 %v1037_v6 }
 0x17a   : > { %v777_v14 = vpop.permute.xlu1 %776 }
 0x17b   : > { %vm796_vm1 = vcmp.eq.s32.totalorder %v777_v14, %v2126_v45  ;;  %vm797_vm2 = vcmp.eq.s32.totalorder %v777_v14, %v2135_v47 }
 0x17c   : > { %v1553_v27 = vsel %vm796_vm1, 1.0, %v1893_v7  ;;  %v1554_v46 = vsel %vm797_vm2, 1.0, %v1893_v7 }
 0x17d   : > { %v844_v29 = vadd.f32 %v1553_v27, %v756_v15  ;;  %v845_v36 = vadd.f32 %v1554_v46, %v757_v16 }
 0x183   : > { %v865_v55 = vpop.permute.xlu1 %864 }
 0x184   : > { %vm884_vm7 = vcmp.eq.s32.totalorder %v865_v55, %v2126_v45  ;;  %vm885_vm8 = vcmp.eq.s32.totalorder %v865_v55, %v2135_v47  ;;  %v1228_v45 = vmax.f32 %v2077_v31, 1.0  ;;  %v1229_v47 = vmax.f32 %v2085_v34, 1.0 }
 0x185   : > { %v1569_v44 = vsel %vm884_vm7, 1.0, %v1893_v7  ;;  %v1570_v49 = vsel %vm885_vm8, 1.0, %v1893_v7  ;;  %v1225_v31 = vmax.f32 %v2093_v37, 1.0 }
 0x186   : > { %v932_v18 = vadd.f32 %v1569_v44, %v844_v29  ;;  %v933_v60 = vadd.f32 %v1570_v49, %v845_v36  ;;  %1794 = vrcp.f32 %v1228_v45 }
 0x187   : > { %1796 = vrcp.f32 %v1229_v47 }
 0x188   : > { %v1020_v0 = vadd.f32 %v1585_v51, %v932_v18  ;;  %v1021_v1 = vadd.f32 %v1586_v56, %v933_v60  ;;  %1798 = vrcp.f32 %v1224_v12 }
 0x189   : > { %1800 = vrcp.f32 %v1225_v31 }
 0x18a   : > { %v1032_v25 = vpack.c.bf16 %v1020_v0, %v1018_v20  ;;  %v1033_v10 = vpack.c.bf16 %v1021_v1, %v1019_v63  ;;  %1802 = vrcp.f32 %v1230_v57 }
 0x18b   : > { %1804 = vrcp.f32 %v1231_v58 }
 0x18c   : > { %1179 = vmatmul.bf16.gmra.mxu0 %v1032_v25  ;;  %1208 = vmatmul.bf16.gmra.mxu1 %v1033_v10  ;;  %v1795_v62 = vpop.eup %1794  ;;  %1806 = vrcp.f32 %v1226_v9 }
 0x18d   : > { %v1797_v54 = vpop.eup %1796  ;;  %1808 = vrcp.f32 %v1227_v41 }
 0x18e   : > { %v1799_v5 = vpop.eup %1798 }
 0x18f   : > { %v1801_v32 = vpop.eup %1800 }
 0x190   : > { %v1803_v3 = vpop.eup %1802 }
 0x191   : > { %v1805_v39 = vpop.eup %1804 }
 0x192   : > { %v1807_v15 = vpop.eup %1806 }
 0x193   : > { %v1809_v24 = vpop.eup %1808 }
 0x1bc   : > { %v1185_v52 = vpop.f32.mrf.mxu2  ;;  %v1214_v53 = vpop.f32.mrf.mxu3 }
 0x1bd   : > { %v1215_v7 = vadd.f32 %v1214_v53, %v1185_v52 }
 0x1bf   : > { %v2636_v11 = vmul.f32 %v1795_v62, %v1215_v7 }
 0x1c4   : > { %v1187_v13 = vpop.f32.mrf.mxu2  ;;  %v1216_v19 = vpop.f32.mrf.mxu3 }
 0x1c5   : > { %v1217_v23 = vadd.f32 %v1216_v19, %v1187_v13 }
 0x1c7   : > { %v2639_v22 = vmul.f32 %v1797_v54, %v1217_v23 }
 0x1c8   : > { %v1175_v2 = vpop.f32.mrf.mxu0  ;;  %v1204_v34 = vpop.f32.mrf.mxu1 }
 0x1c9   : > { %v1205_v33 = vadd.f32 %v1204_v34, %v1175_v2 }
 0x1cb   : > { %v2642_v6 = vmul.f32 %v1799_v5, %v1205_v33 }
 0x1d0   : > { %v1177_v30 = vpop.f32.mrf.mxu0  ;;  %v1206_v21 = vpop.f32.mrf.mxu1 }
 0x1d1   : > { %v1207_v40 = vadd.f32 %v1206_v21, %v1177_v30 }
 0x1d3   : > { %v2644_v14 = vmul.f32 %v1801_v32, %v1207_v40 }
 0x1fb   : > { %v1190_v4 = vpop.f32.mrf.mxu2  ;;  %v1219_v37 = vpop.f32.mrf.mxu3 }
 0x1fc   : > { %v1220_v59 = vadd.f32 %v1219_v37, %v1190_v4 }
 0x1fe   : > { %v2648_v8 = vmul.f32 %v1803_v3, %v1220_v59 }
 0x203   : > { %v1192_v28 = vpop.f32.mrf.mxu2  ;;  %v1221_v17 = vpop.f32.mrf.mxu3 }
 0x204   : > { %v1222_v61 = vadd.f32 %v1221_v17, %v1192_v28 }
 0x206   : > { %v2651_v43 = vmul.f32 %v1805_v39, %v1222_v61 }
 0x209   : > { %v1180_v42 = vpop.f32.mrf.mxu0  ;;  %v1209_v27 = vpop.f32.mrf.mxu1 }
 0x20a   : > { %v1210_v46 = vadd.f32 %v1209_v27, %v1180_v42 }
 0x20c   : > { %v2654_v16 = vmul.f32 %v1807_v15, %v1210_v46 }
 0x210   : > { %1252 = sbr.rel (%p1659_p12) target bundleno = 671 (0x29f), region = 40 }
 0x211   : > { %v1182_v48 = vpop.f32.mrf.mxu0  ;;  %v1211_v26 = vpop.f32.mrf.mxu1 }
 0x212   : > { %v1212_v35 = vadd.f32 %v1211_v26, %v1182_v48 }
 0x214   : > { %v2656_v50 = vmul.f32 %v1809_v24, %v1212_v35 }
 0x215   : > { %v1255_v38 = vld [vmem:[%s1994_s15 + $0x10] sm:$0xff]  ;;  %v1253_v55 = vld [vmem:[%s1994_s15] sm:$0xff]  ;;  %v1901_v29 = vmov 0   ;;  %v1256_v49 = vld [vmem:[%s1994_s15 + $0x18] sm:$0xff] }
 0x216   : > { %1811 = vset.pattern.permute.xlu1 %v1901_v29  ;;  %1810 = vset.pattern.permute.xlu0 %v1901_v29  ;;  %vm1263_vm9 = vcmp.gt.s32.totalorder %v1255_v38, 0  ;;  %vm1261_vm10 = vcmp.gt.s32.totalorder %v1253_v55, 0  ;;  %v1254_v51 = vld [vmem:[%s1994_s15 + $0x8] sm:$0xff]  ;;  %v1257_v56 = vld [vmem:[%s1994_s15 + $0x20] sm:$0xff]  ;;  %vm1264_vm12 = vcmp.gt.s32.totalorder %v1256_v49, 0  ;;  %v1260_v0 = vld [vmem:[%s1994_s15 + $0x38] sm:$0xff] }
 0x217   : > { %v1279_v36 = vsel %vm1263_vm9, 1, %v1901_v29  ;;  %v1277_v44 = vsel %vm1261_vm10, 1, %v1901_v29  ;;  %1812 = vset.pattern.permute.xlu2 %v1901_v29  ;;  %vm1265_vm11 = vcmp.gt.s32.totalorder %v1257_v56, 0  ;;  %v1258_v60 = vld [vmem:[%s1994_s15 + $0x28] sm:$0xff]  ;;  %vm1262_vm13 = vcmp.gt.s32.totalorder %v1254_v51, 0  ;;  %v1259_v1 = vld [vmem:[%s1994_s15 + $0x30] sm:$0xff] }
 0x218   : > { %1292 = vperm.xlu1 %1811, %v1279_v36   ;;  %1286 = vperm.xlu0 %1810, %v1277_v44   ;;  %v1281_v18 = vsel %vm1265_vm11, 1, %v1901_v29  ;;  %vm1266_vm14 = vcmp.gt.s32.totalorder %v1258_v60, 0  ;;  %v1280_v20 = vsel %vm1264_vm12, 1, %v1901_v29  ;;  %v1278_v63 = vsel %vm1262_vm13, 1, %v1901_v29  ;;  %v1273_v47 = vld [vmem:[%s2132_s29 + $0x20] sm:$0xff]  ;;  %v1274_v7 = vld [vmem:[%s2132_s29 + $0x28] sm:$0xff] }
 0x219   : > { %1298 = vperm.xlu2 %1812, %v1281_v18   ;;  %v1282_v25 = vsel %vm1266_vm14, 1, %v1901_v29  ;;  %vm1268_vm15 = vcmp.gt.s32.totalorder %v1260_v0, 0  ;;  %vm1267_vm0 = vcmp.gt.s32.totalorder %v1259_v1, 0  ;;  %v1271_v13 = vld [vmem:[%s2132_s29 + $0x10] sm:$0xff]  ;;  %v1269_v19 = vld [vmem:[%s2132_s29] sm:$0xff]  ;;  %v1272_v34 = vld [vmem:[%s2132_s29 + $0x18] sm:$0xff] }
 0x21a   : > { %v1284_v10 = vsel %vm1268_vm15, 1, %v1901_v29  ;;  %v1283_v45 = vsel %vm1267_vm0, 1, %v1901_v29  ;;  %v1270_v33 = vld [vmem:[%s2132_s29 + $0x8] sm:$0xff]  ;;  %v1276_v32 = vld [vmem:[%s2132_s29 + $0x38] sm:$0xff]  ;;  %v1275_v57 = vld [vmem:[%s2132_s29 + $0x30] sm:$0xff] }
 0x220   : > { %1295 = vperm.xlu1 %1811, %v1280_v20   ;;  %1289 = vperm.xlu0 %1810, %v1278_v63  }
 0x221   : > { %1301 = vperm.xlu2 %1812, %v1282_v25  }
 0x228   : > { %1307 = vperm.xlu1 %1811, %v1284_v10   ;;  %1304 = vperm.xlu0 %1810, %v1283_v45  }
 0x273   : > { %v1299_v52 = vpop.permute.xlu2 %1298 }
 0x274   : > { %vm1313_vm1 = vcmp.eq.s32.totalorder %v1299_v52, 1 }
 0x275   : > { %v1321_v53 = vsel %vm1313_vm1, %v1273_v47, %v2636_v11 }
 0x276   : > { %1329 = vst [vmem:[%s2659_s17 + $0x20] sm:$0xff] %v1321_v53 }
 0x27b   : > { %v1302_v62 = vpop.permute.xlu2 %1301 }
 0x27c   : > { %vm1314_vm2 = vcmp.eq.s32.totalorder %v1302_v62, 1 }
 0x27d   : > { %v1322_v12 = vsel %vm1314_vm2, %v1274_v7, %v2639_v22 }
 0x27e   : > { %1330 = vst [vmem:[%s2659_s17 + $0x28] sm:$0xff] %v1322_v12 }
 0x28a   : > { %v1293_v23 = vpop.permute.xlu1 %1292  ;;  %v1287_v54 = vpop.permute.xlu0 %1286 }
 0x28b   : > { %vm1311_vm3 = vcmp.eq.s32.totalorder %v1293_v23, 1  ;;  %vm1309_vm4 = vcmp.eq.s32.totalorder %v1287_v54, 1 }
 0x28c   : > { %v1319_v31 = vsel %vm1311_vm3, %v1271_v13, %v2654_v16  ;;  %v1317_v2 = vsel %vm1309_vm4, %v1269_v19, %v2642_v6 }
 0x28d   : > { %1327 = vst [vmem:[%s2659_s17 + $0x10] sm:$0xff] %v1319_v31 }
 0x28e   : > { %1325 = vst [vmem:[%s2659_s17] sm:$0xff] %v1317_v2 }
 0x292   : > { %v1296_v5 = vpop.permute.xlu1 %1295  ;;  %v1290_v30 = vpop.permute.xlu0 %1289 }
 0x293   : > { %vm1312_vm5 = vcmp.eq.s32.totalorder %v1296_v5, 1  ;;  %vm1310_vm6 = vcmp.eq.s32.totalorder %v1290_v30, 1 }
 0x294   : > { %v1320_v21 = vsel %vm1312_vm5, %v1272_v34, %v2656_v50  ;;  %v1318_v40 = vsel %vm1310_vm6, %v1270_v33, %v2644_v14 }
 0x295   : > { %1328 = vst [vmem:[%s2659_s17 + $0x18] sm:$0xff] %v1320_v21 }
 0x296   : > { %1326 = vst [vmem:[%s2659_s17 + $0x8] sm:$0xff] %v1318_v40 }
 0x29a   : > { %v1308_v58 = vpop.permute.xlu1 %1307  ;;  %v1305_v4 = vpop.permute.xlu0 %1304 }
 0x29b   : > { %vm1316_vm7 = vcmp.eq.s32.totalorder %v1308_v58, 1  ;;  %vm1315_vm8 = vcmp.eq.s32.totalorder %v1305_v4, 1 }
 0x29c   : > { %v1324_v37 = vsel %vm1316_vm7, %v1276_v32, %v2651_v43  ;;  %v1323_v59 = vsel %vm1315_vm8, %v1275_v57, %v2648_v8 }
 0x29d   : > { %1332 = vst [vmem:[%s2659_s17 + $0x38] sm:$0xff] %v1324_v37 }
 0x29e   : > { %1331 = vst [vmem:[%s2659_s17 + $0x30] sm:$0xff] %v1323_v59 }
 0x29f PF: > { %s1333_s15 = sld [smem:[#allocation3 + %s1958_s0]] }
 0x2a5   : > { %p1660_p13 = scmp.ne.s32.totalorder %s1333_s15, 0 }
 0x2a7   : > { %1337 = sbr.rel (%p1660_p13) target bundleno = 692 (0x2b4), region = 44 }
 0x2ac   : > { %1338 = vst [vmem:[%s2659_s17] sm:$0xff] %v2642_v6 }
 0x2ad   : > { %1339 = vst [vmem:[%s2659_s17 + $0x8] sm:$0xff] %v2644_v14 }
 0x2ae   : > { %1340 = vst [vmem:[%s2659_s17 + $0x10] sm:$0xff] %v2654_v16 }
 0x2af   : > { %1341 = vst [vmem:[%s2659_s17 + $0x18] sm:$0xff] %v2656_v50 }
 0x2b0   : > { %1342 = vst [vmem:[%s2659_s17 + $0x20] sm:$0xff] %v2636_v11 }
 0x2b1   : > { %1343 = vst [vmem:[%s2659_s17 + $0x28] sm:$0xff] %v2639_v22 }
 0x2b2   : > { %1344 = vst [vmem:[%s2659_s17 + $0x30] sm:$0xff] %v2648_v8 }
 0x2b3   : > { %1345 = vst [vmem:[%s2659_s17 + $0x38] sm:$0xff] %v2651_v43 }
 0x2b4 PF: > { %s1682_s18 = sshll.u32 %s1958_s0, 6  ;;  %s1359_s21 = sshll.u32 %s2659_s17, 4  ;;  %s1360_s21 = int_to_ptr.vmem [resolvable:$true] %s1359_s21 }
 0x2b5   : > { %s1358_s20 = scalar_lea.hbm %s2750_s5, %s1682_s18  ;;  %s1347_s28 = scalar_lea.sflag [#allocation5], %s240_s16 }
 0x2b6   : > { %s1361_s26 = sshll.u32 %s1358_s20, 4  ;;  %s1845_s0 = scalar_lea.hbm %s2750_s5, 128  ;;  %s1362_s26 = int_to_ptr.hbm [resolvable:$true] %s1361_s26 }
 0x2b7   : > { %s1839_s8 = sshra.s32 %s1362_s26, 4  ;;  %s1840_s8 = int_to_ptr.hbm [resolvable:$true] %s1839_s8 }
 0x2b8   : > { %s1841_s9 = scalar_lea.hbm %s1840_s8, 64  ;;  %p1846_p3 = scmp.lt.s32.totalorder %s1840_s8, %s2750_s5 }
 0x2b9   : > { %p1842_p0 = scmp.ne.s32.totalorder %s1840_s8, %s1841_s9  ;;  %p1847_p4 = scmp.lt.s32.totalorder %s1845_s0, %s1841_s9 }
 0x2bb   : > { %p1843_p1 = pnand %p1842_p0, %p1975_p5  ;;  %p1848_p7 = por %p1847_p4, %p1846_p3 }
 0x2bd   : > { %p1844_p2 = pneg %p1843_p1 }
 0x2bf   : > { %p1849_p8 = pnand %p1848_p7, %p1844_p2 }
 0x2c1   : > { %1852 = shalt.err (!%p1849_p8)
}
 0x2c2   : > { %s1902_s16 = smov 128   ;;  %s1903_s14 = smov 8  }
 0x2c3   : > { %1699 = dma.vmem_to_hbm [thread:$0]  (%p1975_p5), %s1360_s21, 1024, %s1362_s26, %s1347_s28, %s1902_s16, %s1902_s16, %s1903_s14  }
 0x2c4 PF: > { %p1705_p9 = scmp.ge.s32.totalorder %s1889_s25, 2  ;;  %s1376_s17 = sand.u32 1, %s1877_s22  }
 0x2c5   : > { %s1377_s15 = scalar_lea.sflag [#allocation5], %s1376_s17 }
 0x2c6   : > { %p1702_p10 = pnand %p1705_p9, %p1979_p6 }
 0x2c8   : > { %p1703_p11 = pneg %p1702_p10 }
 0x2ca   : > { %1872 = dma.done.wait (%p1703_p11), %s1377_s15, 1024  }
 0x2cb   : > { %1874 = vsyncadd (%p1703_p11), %s1377_s15, 4294966272  ;;  %p23_p12 = scmp.ge.s32.totalorder %s1962_s27, 4   ;;  %s2753_s22 = smov %s1881_s23 }
 0x2cc   : > { %s2754_s23 = smov %s1885_s24  ;;  %s2755_s24 = smov %s1973_s30 }
 0x2cd   : > { %s2756_s25 = smov %s1962_s27  ;;  %25 = sbr.rel (!%p23_p12) target bundleno = 9 (0x9), region = 85 }
 0x2d2   :  { %1383 = vsyncpa [#allocation5], 1 }
 0x2d3   :  { %1385 = vsyncpa [#allocation5 + $0x1], 1 }

</bundles_post_ra>
